<compile_context>
chip_gen: v6e
topology: v6e:2x2x1
jax: 0.10.0
libtpu: 0.0.40
codegen_flags: <defaults>
</compile_context>

<pallas_src>
import functools

import jax
import jax.numpy as jnp
from jax import lax
from jax.experimental import pallas as pl
from jax.experimental.pallas import tpu as pltpu

# --- small test hyperparameters (structure identical to bigram_v2.py) ---
VOCAB_SIZE = 65
VOCAB_PAD = 128       # lane-dense padded vocab (unmasked vst + clean MXU N dim)
N_EMBD = 128          # n_embd
N_HEAD = 4            # n_head  (head_size = 32)
HEAD_SIZE = N_EMBD // N_HEAD
N_LAYER = 2           # n_layer
BLOCK_SIZE = 16       # block_size (max context)
EPS = 1e-5            # nn.LayerNorm default eps
NEG_INF = -1e30       # additive causal mask; diagonal is always unmasked -> row max finite


def _layernorm_1pass(x, w, b):
    """LayerNorm with single-pass statistics (mean and E[x^2])."""
    mu = jnp.mean(x, axis=-1, keepdims=True)
    ms = jnp.mean(x * x, axis=-1, keepdims=True)
    var = ms - mu * mu
    return (x - mu) * lax.rsqrt(var + EPS) * w + b


# ----------------------------- fused Pallas kernel -------------------------- #

def fused_block_kernel(n_head, seq_len,
                       idx_ref, tok_ref, pos_ref,
                       wqkv_ref, wproj_ref, w1_ref, w2_ref, vec_ref, b1_ref,
                       lmw_ref, lmb_ref,
                       out_ref, x_ref):
    """One (sequence, layer) grid step of the BigramLanguageModel forward.

    grid = (B, N_LAYER): axis 0 ("parallel") picks a sequence, axis 1 ("arbitrary")
    walks the transformer layers with the (T, C) activations resident in the VMEM
    scratch `x_ref`.  Per-layer weights arrive pipelined via BlockSpec (bf16).
    """
    T = seq_len
    C = N_EMBD
    HS = C // n_head
    lyr = pl.program_id(1)

    # ---- layer 0: token-embedding gather (one-hot matmul on MXU) + positional emb ----
    @pl.when(lyr == 0)
    def _():
        onehot = (idx_ref[...] ==
                  lax.broadcasted_iota(jnp.int32, (T, VOCAB_PAD), 1)).astype(jnp.bfloat16)
        x_ref[...] = (jnp.dot(onehot, tok_ref[...],
                              preferred_element_type=jnp.float32) + pos_ref[...])

    x = x_ref[...]                     # (T, C) f32 activations
    vec = vec_ref[0]                   # (8, C): ln1w, ln1b, bproj, ln2w, ln2b, b2, 0, 0

    # ---- multi-head causal self-attention: x = x + proj(concat(heads)) ----
    h = _layernorm_1pass(x, vec[0:1], vec[1:2]).astype(jnp.bfloat16)
    qkv = jnp.dot(h, wqkv_ref[0],                      # ONE (T,C)@(C,3C) matmul;
                  preferred_element_type=jnp.float32)  # 1/sqrt(hs) folded into Wq cols
    qkv = qkv.astype(jnp.bfloat16)

    row = lax.broadcasted_iota(jnp.int32, (T, T), 0)
    col = lax.broadcasted_iota(jnp.int32, (T, T), 1)
    bias = jnp.where(col <= row, 0.0, NEG_INF).astype(jnp.float32)   # per-sequence causal

    heads = []
    for hd in range(n_head):           # static loop over heads
        q = qkv[:, hd * HS:(hd + 1) * HS]
        k = qkv[:, C + hd * HS:C + (hd + 1) * HS]
        v = qkv[:, 2 * C + hd * HS:2 * C + (hd + 1) * HS]
        s = lax.dot_general(q, k, (((1,), (1,)), ((), ())),
                            preferred_element_type=jnp.float32) + bias
        p = jnp.exp(s - jnp.max(s, axis=-1, keepdims=True))
        p = p * pl.reciprocal(jnp.sum(p, axis=-1, keepdims=True), approx=True)
        # attention dropout: identity (eval mode)
        heads.append(jnp.dot(p.astype(jnp.bfloat16), v,
                             preferred_element_type=jnp.float32))
    sa = jnp.concatenate(heads, axis=-1).astype(jnp.bfloat16)        # (T, C)
    x = x + jnp.dot(sa, wproj_ref[0], preferred_element_type=jnp.float32) + vec[2:3]

    # ---- feed-forward: x = x + W2 @ relu(W1 @ ln2(x)) ----
    h2 = _layernorm_1pass(x, vec[3:4], vec[4:5]).astype(jnp.bfloat16)
    ff = jnp.dot(h2, w1_ref[0], preferred_element_type=jnp.float32) + b1_ref[0]
    ff = jnp.maximum(ff, 0.0).astype(jnp.bfloat16)
    x = x + jnp.dot(ff, w2_ref[0], preferred_element_type=jnp.float32) + vec[5:6]
    # ffwd dropout: identity (eval mode)

    x_ref[...] = x

    # ---- last layer: LM head.  NOTE: reference forward() never applies self.ln_f ----
    @pl.when(lyr == pl.num_programs(1) - 1)
    def _():
        out_ref[...] = (jnp.dot(x.astype(jnp.bfloat16), lmw_ref[...],
                                preferred_element_type=jnp.float32) + lmb_ref[...])


# ----------------------------- wrapper -------------------------------------- #

@jax.jit
def forward(idx, prep):
    """idx: int32 (B, T) token ids (T <= BLOCK_SIZE, T % 8 == 0).
    Returns logits (B, T, VOCAB_SIZE)."""
    B, T = idx.shape
    C = N_EMBD
    idx_flat = idx.reshape(B * T, 1).astype(jnp.int32)
    pos = prep["pos_emb"][:T]                                        # (T, C) f32

    inputs = (idx_flat, prep["tok_emb_pad"], pos,
              prep["wqkv"], prep["wproj"], prep["w1"], prep["w2"],
              prep["vecs"], prep["b1"],
              prep["lm_w_pad"], prep["lm_b_pad"])

    in_specs = [
        pl.BlockSpec((T, 1), lambda b, l: (b, 0)),                   # token ids (per seq)
        pl.BlockSpec((VOCAB_PAD, C), lambda b, l: (0, 0)),           # tok emb (resident)
        pl.BlockSpec((T, C), lambda b, l: (0, 0)),                   # pos emb (resident)
        pl.BlockSpec((1, C, 3 * C), lambda b, l: (l, 0, 0)),         # fused Wqkv (layer l)
        pl.BlockSpec((1, C, C), lambda b, l: (l, 0, 0)),             # Wproj
        pl.BlockSpec((1, C, 4 * C), lambda b, l: (l, 0, 0)),         # FFN W1
        pl.BlockSpec((1, 4 * C, C), lambda b, l: (l, 0, 0)),         # FFN W2
        pl.BlockSpec((1, 8, C), lambda b, l: (l, 0, 0)),             # packed LN/bias vecs
        pl.BlockSpec((1, 1, 4 * C), lambda b, l: (l, 0, 0)),         # FFN bias1
        pl.BlockSpec((C, VOCAB_PAD), lambda b, l: (0, 0)),           # LM head W (resident)
        pl.BlockSpec((1, VOCAB_PAD), lambda b, l: (0, 0)),           # LM head b (resident)
    ]

    kern = functools.partial(fused_block_kernel, N_HEAD, T)
    logits_pad = pl.pallas_call(
        kern,
        out_shape=jax.ShapeDtypeStruct((B * T, VOCAB_PAD), jnp.float32),
        grid_spec=pltpu.PrefetchScalarGridSpec(
            num_scalar_prefetch=0,
            grid=(B, N_LAYER),
            in_specs=in_specs,
            out_specs=pl.BlockSpec((T, VOCAB_PAD), lambda b, l: (b, 0)),
            scratch_shapes=[pltpu.VMEM((T, C), jnp.float32)],        # resident activations
        ),
        compiler_params=pltpu.CompilerParams(
            dimension_semantics=("parallel", "arbitrary")),
    )(*inputs)
    return logits_pad[:, :VOCAB_SIZE].reshape(B, T, VOCAB_SIZE)


# ----------------------------- parameters ----------------------------------- #

def init_params(key):
    """Canonical (PyTorch-layout) parameters: y = x @ W + b."""
    def nrm(k, shape, scale=0.02):
        return (scale * jax.random.normal(k, shape)).astype(jnp.float32)

    keys = iter(jax.random.split(key, 8 + 8 * N_LAYER))
    C = N_EMBD
    params = {
        "tok_emb": nrm(next(keys), (VOCAB_SIZE, C)),
        "pos_emb": nrm(next(keys), (BLOCK_SIZE, C)),
        "lm_w": nrm(next(keys), (C, VOCAB_SIZE)),
        "lm_b": jnp.zeros((1, VOCAB_SIZE), jnp.float32),
        "blocks": [],
    }
    for _ in range(N_LAYER):
        blk = (
            jnp.ones((1, C), jnp.float32),            # ln1 weight
            jnp.zeros((1, C), jnp.float32),           # ln1 bias
            nrm(next(keys), (C, C)),                  # Wq (all heads concat)
            nrm(next(keys), (C, C)),                  # Wk
            nrm(next(keys), (C, C)),                  # Wv
            nrm(next(keys), (C, C)),                  # Wproj
            jnp.zeros((1, C), jnp.float32),           # bproj
            jnp.ones((1, C), jnp.float32),            # ln2 weight
            jnp.zeros((1, C), jnp.float32),           # ln2 bias
            nrm(next(keys), (C, 4 * C)),              # ffn W1
            jnp.zeros((1, 4 * C), jnp.float32),       # ffn b1
            nrm(next(keys), (4 * C, C)),              # ffn W2
            jnp.zeros((1, C), jnp.float32),           # ffn b2
        )
        params["blocks"].append(blk)
    return params


def prepare_params(params):
    """One-time host-side transforms: pad vocab to 128 lanes, fuse Q/K/V into one
    (C, 3C) matrix per layer with the 1/sqrt(head_size) scale folded into Wq, stack
    everything along a leading N_LAYER axis (grid-pipelined), cast matmul weights to
    bf16, and pack the small (1, C) LayerNorm/bias vectors into one array."""
    C, H, HS = N_EMBD, N_HEAD, HEAD_SIZE
    scale = float(HS) ** (-0.5)
    bf16 = jnp.bfloat16

    tok_pad = jnp.zeros((VOCAB_PAD, C), jnp.float32).at[:VOCAB_SIZE].set(
        params["tok_emb"]).astype(bf16)
    lm_w_pad = jnp.zeros((C, VOCAB_PAD), jnp.float32).at[:, :VOCAB_SIZE].set(
        params["lm_w"]).astype(bf16)
    lm_b_pad = jnp.zeros((1, VOCAB_PAD), jnp.float32).at[:, :VOCAB_SIZE].set(
        params["lm_b"])

    wqkv, wproj, w1s, w2s, vecs, b1s = [], [], [], [], [], []
    for (ln1w, ln1b, wq, wk, wv, wp, bp, ln2w, ln2b, w1, b1, w2, b2) in params["blocks"]:
        wqkv.append(jnp.concatenate([wq * scale, wk, wv], axis=1))   # (C, 3C)
        wproj.append(wp)                                             # (C, C)
        w1s.append(w1)                                               # (C, 4C)
        w2s.append(w2)                                               # (4C, C)
        vecs.append(jnp.concatenate(
            [ln1w, ln1b, bp, ln2w, ln2b, b2,
             jnp.zeros((2, C), jnp.float32)], axis=0))               # (8, C)
        b1s.append(b1)                                               # (1, 4C)

    return {
        "tok_emb_pad": tok_pad,
        "pos_emb": params["pos_emb"],
        "lm_w_pad": lm_w_pad,
        "lm_b_pad": lm_b_pad,
        "wqkv": jnp.stack(wqkv).astype(bf16),       # (L, C, 3C)
        "wproj": jnp.stack(wproj).astype(bf16),     # (L, C, C)
        "w1": jnp.stack(w1s).astype(bf16),          # (L, C, 4C)
        "w2": jnp.stack(w2s).astype(bf16),          # (L, 4C, C)
        "vecs": jnp.stack(vecs),                    # (L, 8, C)  f32
        "b1": jnp.stack(b1s),                       # (L, 1, 4C) f32
    }


# ----------------------------- pure-JAX reference ---------------------------- #

def _layernorm_ref(x, w, b):
    mu = jnp.mean(x, axis=-1, keepdims=True)
    var = jnp.mean((x - mu) ** 2, axis=-1, keepdims=True)
    return (x - mu) * lax.rsqrt(var + EPS) * w + b


def _masked_softmax(wei, allowed):
    wei = jnp.where(allowed, wei, -jnp.inf)
    wei = wei - jnp.max(wei, axis=-1, keepdims=True)
    wei = jnp.exp(wei)
    return wei / jnp.sum(wei, axis=-1, keepdims=True)


def forward_ref(idx, params):
    B, T = idx.shape
    tok_emb = jnp.take(params["tok_emb"], idx, axis=0)
    pos_emb = jnp.take(params["pos_emb"], jnp.arange(T), axis=0)
    x = tok_emb + pos_emb[None]
    row = lax.broadcasted_iota(jnp.int32, (T, T), 0)
    col = lax.broadcasted_iota(jnp.int32, (T, T), 1)
    causal = col <= row
    hs = N_EMBD // N_HEAD
    for (ln1w, ln1b, wq, wk, wv, wp, bp, ln2w, ln2b, w1, b1, w2, b2) in params["blocks"]:
        h = _layernorm_ref(x, ln1w[0], ln1b[0])
        q, k, v = h @ wq, h @ wk, h @ wv
        outs = []
        for hd in range(N_HEAD):
            qh = q[..., hd * hs:(hd + 1) * hs]
            kh = k[..., hd * hs:(hd + 1) * hs]
            vh = v[..., hd * hs:(hd + 1) * hs]
            wei = jnp.einsum("btd,bsd->bts", qh, kh) * hs ** -0.5
            wei = _masked_softmax(wei, causal)
            outs.append(jnp.einsum("bts,bsd->btd", wei, vh))
        x = x + (jnp.concatenate(outs, -1) @ wp + bp[0])
        h2 = _layernorm_ref(x, ln2w[0], ln2b[0])
        x = x + (jnp.maximum(h2 @ w1 + b1[0], 0.0) @ w2 + b2[0])
    return x @ params["lm_w"] + params["lm_b"][0]


if __name__ == "__main__":
    key = jax.random.PRNGKey(0)
    pkey, dkey = jax.random.split(key)
    params = init_params(pkey)
    prep = prepare_params(params)

    B, T = 2, 8                      # T <= BLOCK_SIZE, T % 8 == 0
    idx = jax.random.randint(dkey, (B, T), 0, VOCAB_SIZE, dtype=jnp.int32)

    logits = jax.block_until_ready(forward(idx, prep))

    assert logits.shape == (B, T, VOCAB_SIZE)
    assert bool(jnp.all(jnp.isfinite(logits)))

    ref = jax.block_until_ready(forward_ref(idx, params))
    # Tolerance accounts for bf16 matmul inputs (f32 accumulate) + approx reciprocal.
    assert bool(jnp.allclose(logits, ref, rtol=5e-2, atol=1e-2)), "mismatch vs reference"

    print("KERNEL_OK")
</pallas_src>

<mosaic_0001>
module attributes {stable_mosaic.version = 11 : i64} {
  func.func @fused_block_kernel(%arg0: i32, %arg1: i32, %arg2: memref<8x1xi32, #tpu.memory_space<vmem>>, %arg3: memref<128x128xbf16, #tpu.memory_space<vmem>>, %arg4: memref<8x128xf32, #tpu.memory_space<vmem>>, %arg5: memref<1x128x384xbf16, #tpu.memory_space<vmem>>, %arg6: memref<1x128x128xbf16, #tpu.memory_space<vmem>>, %arg7: memref<1x128x512xbf16, #tpu.memory_space<vmem>>, %arg8: memref<1x512x128xbf16, #tpu.memory_space<vmem>>, %arg9: memref<1x8x128xf32, #tpu.memory_space<vmem>>, %arg10: memref<1x1x512xf32, #tpu.memory_space<vmem>>, %arg11: memref<128x128xbf16, #tpu.memory_space<vmem>>, %arg12: memref<1x128xf32, #tpu.memory_space<vmem>>, %arg13: memref<8x128xf32, #tpu.memory_space<vmem>>, %arg14: memref<8x128xf32, #tpu.memory_space<vmem>>) attributes {dimension_semantics = [#tpu.dimension_semantics<parallel>, #tpu.dimension_semantics<arbitrary>], iteration_bounds = array<i64: 2, 2>, scalar_prefetch = 0 : i64, scratch_operands = 1 : i64, tpu.core_type = #tpu.core_type<tc>, window_params = [{transform_indices = @transform_0, window_bounds = array<i64: 8, 1>}, {pipeline_mode = #tpu.pipeline_mode<synchronous>, transform_indices = @transform_1, window_bounds = array<i64: 128, 128>}, {pipeline_mode = #tpu.pipeline_mode<synchronous>, transform_indices = @transform_2, window_bounds = array<i64: 8, 128>}, {transform_indices = @transform_3, window_bounds = array<i64: 1, 128, 384>}, {transform_indices = @transform_4, window_bounds = array<i64: 1, 128, 128>}, {transform_indices = @transform_5, window_bounds = array<i64: 1, 128, 512>}, {transform_indices = @transform_6, window_bounds = array<i64: 1, 512, 128>}, {transform_indices = @transform_7, window_bounds = array<i64: 1, 8, 128>}, {transform_indices = @transform_8, window_bounds = array<i64: 1, 1, 512>}, {pipeline_mode = #tpu.pipeline_mode<synchronous>, transform_indices = @transform_9, window_bounds = array<i64: 128, 128>}, {pipeline_mode = #tpu.pipeline_mode<synchronous>, transform_indices = @transform_10, window_bounds = array<i64: 1, 128>}, {transform_indices = @transform_11, window_bounds = array<i64: 8, 128>}]} {
    %c0_i32 = arith.constant 0 : i32
    %0 = arith.cmpi eq, %arg1, %c0_i32 : i32
    %1 = arith.extui %0 : i1 to i32
    %c0_i32_0 = arith.constant 0 : i32
    %2 = arith.cmpi ne, %1, %c0_i32_0 : i32
    scf.if %2 {
      %c0_55 = arith.constant 0 : index
      %c0_56 = arith.constant 0 : index
      %164 = vector.load %arg2[%c0_55, %c0_56] : memref<8x1xi32, #tpu.memory_space<vmem>>, vector<8x1xi32>
      %165 = tpu.iota {dimensions = array<i32: 1>} : vector<8x128xi32>
      %166 = vector.broadcast %164 : vector<8x1xi32> to vector<8x128xi32>
      %167 = arith.cmpi eq, %166, %165 : vector<8x128xi32>
      %168 = arith.extui %167 : vector<8x128xi1> to vector<8x128xi32>
      %169 = arith.sitofp %168 : vector<8x128xi32> to vector<8x128xf32>
      %170 = arith.truncf %169 : vector<8x128xf32> to vector<8x128xbf16>
      %c0_57 = arith.constant 0 : index
      %c0_58 = arith.constant 0 : index
      %171 = vector.load %arg3[%c0_57, %c0_58] : memref<128x128xbf16, #tpu.memory_space<vmem>>, vector<128x128xbf16>
      %cst_59 = arith.constant dense<0.000000e+00> : vector<8x128xf32>
      %172 = tpu.matmul %170, %171, %cst_59 {dimension_numbers = #tpu.dot_dimension_numbers<[1], [0], [0], [1], [0, 0, 1, 1], [], []>} : vector<8x128xbf16>, vector<128x128xbf16>, vector<8x128xf32> -> vector<8x128xf32>
      %c0_60 = arith.constant 0 : index
      %c0_61 = arith.constant 0 : index
      %173 = vector.load %arg4[%c0_60, %c0_61] : memref<8x128xf32, #tpu.memory_space<vmem>>, vector<8x128xf32>
      %174 = arith.addf %172, %173 : vector<8x128xf32>
      %c0_62 = arith.constant 0 : index
      %c0_63 = arith.constant 0 : index
      %175 = vector.load %arg14[%c0_62, %c0_63] : memref<8x128xf32, #tpu.memory_space<vmem>>, vector<8x128xf32>
      tpu.vector_store %arg14[%c0_62, %c0_63], %174 {strides = array<i32>} : memref<8x128xf32, #tpu.memory_space<vmem>>, vector<8x128xf32>,
    } else {
    }
    %c0 = arith.constant 0 : index
    %c0_1 = arith.constant 0 : index
    %3 = vector.load %arg14[%c0, %c0_1] : memref<8x128xf32, #tpu.memory_space<vmem>>, vector<8x128xf32>
    %c0_2 = arith.constant 0 : index
    %c0_3 = arith.constant 0 : index
    %c0_4 = arith.constant 0 : index
    %4 = vector.load %arg9[%c0_2, %c0_3, %c0_4] : memref<1x8x128xf32, #tpu.memory_space<vmem>>, vector<1x8x128xf32>
    %5 = vector.shape_cast %4 : vector<1x8x128xf32> to vector<8x128xf32>
    %6 = vector.extract_strided_slice %5 {offsets = [0, 0], sizes = [1, 128], strides = [1, 1]} : vector<8x128xf32> to vector<1x128xf32>
    %7 = vector.extract_strided_slice %5 {offsets = [1, 0], sizes = [1, 128], strides = [1, 1]} : vector<8x128xf32> to vector<1x128xf32>
    %cst = arith.constant dense<0.000000e+00> : vector<8xf32>
    %8 = vector.multi_reduction <add>, %3, %cst [1] : vector<8x128xf32> to vector<8xf32>
    %9 = vector.shape_cast %8 : vector<8xf32> to vector<8x1xf32>
    %cst_5 = arith.constant 1.280000e+02 : f32
    %10 = vector.broadcast %cst_5 : f32 to vector<8x1xf32>
    %11 = arith.divf %9, %10 : vector<8x1xf32>
    %12 = arith.mulf %3, %3 : vector<8x128xf32>
    %cst_6 = arith.constant dense<0.000000e+00> : vector<8xf32>
    %13 = vector.multi_reduction <add>, %12, %cst_6 [1] : vector<8x128xf32> to vector<8xf32>
    %14 = vector.shape_cast %13 : vector<8xf32> to vector<8x1xf32>
    %cst_7 = arith.constant 1.280000e+02 : f32
    %15 = vector.broadcast %cst_7 : f32 to vector<8x1xf32>
    %16 = arith.divf %14, %15 : vector<8x1xf32>
    %17 = arith.mulf %11, %11 : vector<8x1xf32>
    %18 = arith.subf %16, %17 : vector<8x1xf32>
    %19 = vector.broadcast %11 : vector<8x1xf32> to vector<8x128xf32>
    %20 = arith.subf %3, %19 : vector<8x128xf32>
    %cst_8 = arith.constant 9.99999974E-6 : f32
    %21 = vector.broadcast %cst_8 : f32 to vector<8x1xf32>
    %22 = arith.addf %18, %21 : vector<8x1xf32>
    %23 = math.rsqrt %22 : vector<8x1xf32>
    %24 = vector.broadcast %23 : vector<8x1xf32> to vector<8x128xf32>
    %25 = arith.mulf %20, %24 : vector<8x128xf32>
    %26 = vector.broadcast %6 : vector<1x128xf32> to vector<8x128xf32>
    %27 = arith.mulf %25, %26 : vector<8x128xf32>
    %28 = vector.broadcast %7 : vector<1x128xf32> to vector<8x128xf32>
    %29 = arith.addf %27, %28 : vector<8x128xf32>
    %30 = arith.truncf %29 : vector<8x128xf32> to vector<8x128xbf16>
    %c0_9 = arith.constant 0 : index
    %c0_10 = arith.constant 0 : index
    %c0_11 = arith.constant 0 : index
    %31 = vector.load %arg5[%c0_9, %c0_10, %c0_11] : memref<1x128x384xbf16, #tpu.memory_space<vmem>>, vector<1x128x384xbf16>
    %32 = vector.shape_cast %31 : vector<1x128x384xbf16> to vector<128x384xbf16>
    %cst_12 = arith.constant dense<0.000000e+00> : vector<8x384xf32>
    %33 = tpu.matmul %30, %32, %cst_12 {dimension_numbers = #tpu.dot_dimension_numbers<[1], [0], [0], [1], [0, 0, 1, 1], [], []>} : vector<8x128xbf16>, vector<128x384xbf16>, vector<8x384xf32> -> vector<8x384xf32>
    %34 = arith.truncf %33 : vector<8x384xf32> to vector<8x384xbf16>
    %35 = tpu.iota {dimensions = array<i32: 0>} : vector<8x8xi32>
    %36 = tpu.iota {dimensions = array<i32: 1>} : vector<8x8xi32>
    %37 = arith.cmpi sle, %36, %35 : vector<8x8xi32>
    %cst_13 = arith.constant 0.000000e+00 : f32
    %cst_14 = arith.constant -1.000000e+30 : f32
    %38 = vector.broadcast %cst_13 : f32 to vector<8x8xf32>
    %39 = vector.broadcast %cst_14 : f32 to vector<8x8xf32>
    %40 = arith.select %37, %38, %39 : vector<8x8xi1>, vector<8x8xf32>
    %41 = vector.extract_strided_slice %34 {offsets = [0, 0], sizes = [8, 32], strides = [1, 1]} : vector<8x384xbf16> to vector<8x32xbf16>
    %42 = vector.extract_strided_slice %34 {offsets = [0, 128], sizes = [8, 32], strides = [1, 1]} : vector<8x384xbf16> to vector<8x32xbf16>
    %43 = vector.extract_strided_slice %34 {offsets = [0, 256], sizes = [8, 32], strides = [1, 1]} : vector<8x384xbf16> to vector<8x32xbf16>
    %cst_15 = arith.constant dense<0.000000e+00> : vector<8x8xf32>
    %44 = tpu.matmul %41, %42, %cst_15 {dimension_numbers = #tpu.dot_dimension_numbers<[1], [1], [0], [0], [0, 0, 1, 0], [], []>} : vector<8x32xbf16>, vector<8x32xbf16>, vector<8x8xf32> -> vector<8x8xf32>
    %45 = arith.addf %44, %40 : vector<8x8xf32>
    %cst_16 = arith.constant dense<0xFF800000> : vector<8xf32>
    %46 = vector.multi_reduction <maximumf>, %45, %cst_16 [1] : vector<8x8xf32> to vector<8xf32>
    %47 = vector.shape_cast %46 : vector<8xf32> to vector<8x1xf32>
    %48 = vector.broadcast %47 : vector<8x1xf32> to vector<8x8xf32>
    %49 = arith.subf %45, %48 : vector<8x8xf32>
    %50 = math.exp %49 : vector<8x8xf32>
    %cst_17 = arith.constant dense<0.000000e+00> : vector<8xf32>
    %51 = vector.multi_reduction <add>, %50, %cst_17 [1] : vector<8x8xf32> to vector<8xf32>
    %52 = vector.shape_cast %51 : vector<8xf32> to vector<8x1xf32>
    %53 = tpu.reciprocal %52 {approx = true} : vector<8x1xf32> -> vector<8x1xf32>
    %54 = vector.broadcast %53 : vector<8x1xf32> to vector<8x8xf32>
    %55 = arith.mulf %50, %54 : vector<8x8xf32>
    %56 = arith.truncf %55 : vector<8x8xf32> to vector<8x8xbf16>
    %cst_18 = arith.constant dense<0.000000e+00> : vector<8x32xf32>
    %57 = tpu.matmul %56, %43, %cst_18 {dimension_numbers = #tpu.dot_dimension_numbers<[1], [0], [0], [1], [0, 0, 1, 1], [], []>} : vector<8x8xbf16>, vector<8x32xbf16>, vector<8x32xf32> -> vector<8x32xf32>
    %58 = vector.extract_strided_slice %34 {offsets = [0, 32], sizes = [8, 32], strides = [1, 1]} : vector<8x384xbf16> to vector<8x32xbf16>
    %59 = vector.extract_strided_slice %34 {offsets = [0, 160], sizes = [8, 32], strides = [1, 1]} : vector<8x384xbf16> to vector<8x32xbf16>
    %60 = vector.extract_strided_slice %34 {offsets = [0, 288], sizes = [8, 32], strides = [1, 1]} : vector<8x384xbf16> to vector<8x32xbf16>
    %cst_19 = arith.constant dense<0.000000e+00> : vector<8x8xf32>
    %61 = tpu.matmul %58, %59, %cst_19 {dimension_numbers = #tpu.dot_dimension_numbers<[1], [1], [0], [0], [0, 0, 1, 0], [], []>} : vector<8x32xbf16>, vector<8x32xbf16>, vector<8x8xf32> -> vector<8x8xf32>
    %62 = arith.addf %61, %40 : vector<8x8xf32>
    %cst_20 = arith.constant dense<0xFF800000> : vector<8xf32>
    %63 = vector.multi_reduction <maximumf>, %62, %cst_20 [1] : vector<8x8xf32> to vector<8xf32>
    %64 = vector.shape_cast %63 : vector<8xf32> to vector<8x1xf32>
    %65 = vector.broadcast %64 : vector<8x1xf32> to vector<8x8xf32>
    %66 = arith.subf %62, %65 : vector<8x8xf32>
    %67 = math.exp %66 : vector<8x8xf32>
    %cst_21 = arith.constant dense<0.000000e+00> : vector<8xf32>
    %68 = vector.multi_reduction <add>, %67, %cst_21 [1] : vector<8x8xf32> to vector<8xf32>
    %69 = vector.shape_cast %68 : vector<8xf32> to vector<8x1xf32>
    %70 = tpu.reciprocal %69 {approx = true} : vector<8x1xf32> -> vector<8x1xf32>
    %71 = vector.broadcast %70 : vector<8x1xf32> to vector<8x8xf32>
    %72 = arith.mulf %67, %71 : vector<8x8xf32>
    %73 = arith.truncf %72 : vector<8x8xf32> to vector<8x8xbf16>
    %cst_22 = arith.constant dense<0.000000e+00> : vector<8x32xf32>
    %74 = tpu.matmul %73, %60, %cst_22 {dimension_numbers = #tpu.dot_dimension_numbers<[1], [0], [0], [1], [0, 0, 1, 1], [], []>} : vector<8x8xbf16>, vector<8x32xbf16>, vector<8x32xf32> -> vector<8x32xf32>
    %75 = vector.extract_strided_slice %34 {offsets = [0, 64], sizes = [8, 32], strides = [1, 1]} : vector<8x384xbf16> to vector<8x32xbf16>
    %76 = vector.extract_strided_slice %34 {offsets = [0, 192], sizes = [8, 32], strides = [1, 1]} : vector<8x384xbf16> to vector<8x32xbf16>
    %77 = vector.extract_strided_slice %34 {offsets = [0, 320], sizes = [8, 32], strides = [1, 1]} : vector<8x384xbf16> to vector<8x32xbf16>
    %cst_23 = arith.constant dense<0.000000e+00> : vector<8x8xf32>
    %78 = tpu.matmul %75, %76, %cst_23 {dimension_numbers = #tpu.dot_dimension_numbers<[1], [1], [0], [0], [0, 0, 1, 0], [], []>} : vector<8x32xbf16>, vector<8x32xbf16>, vector<8x8xf32> -> vector<8x8xf32>
    %79 = arith.addf %78, %40 : vector<8x8xf32>
    %cst_24 = arith.constant dense<0xFF800000> : vector<8xf32>
    %80 = vector.multi_reduction <maximumf>, %79, %cst_24 [1] : vector<8x8xf32> to vector<8xf32>
    %81 = vector.shape_cast %80 : vector<8xf32> to vector<8x1xf32>
    %82 = vector.broadcast %81 : vector<8x1xf32> to vector<8x8xf32>
    %83 = arith.subf %79, %82 : vector<8x8xf32>
    %84 = math.exp %83 : vector<8x8xf32>
    %cst_25 = arith.constant dense<0.000000e+00> : vector<8xf32>
    %85 = vector.multi_reduction <add>, %84, %cst_25 [1] : vector<8x8xf32> to vector<8xf32>
    %86 = vector.shape_cast %85 : vector<8xf32> to vector<8x1xf32>
    %87 = tpu.reciprocal %86 {approx = true} : vector<8x1xf32> -> vector<8x1xf32>
    %88 = vector.broadcast %87 : vector<8x1xf32> to vector<8x8xf32>
    %89 = arith.mulf %84, %88 : vector<8x8xf32>
    %90 = arith.truncf %89 : vector<8x8xf32> to vector<8x8xbf16>
    %cst_26 = arith.constant dense<0.000000e+00> : vector<8x32xf32>
    %91 = tpu.matmul %90, %77, %cst_26 {dimension_numbers = #tpu.dot_dimension_numbers<[1], [0], [0], [1], [0, 0, 1, 1], [], []>} : vector<8x8xbf16>, vector<8x32xbf16>, vector<8x32xf32> -> vector<8x32xf32>
    %92 = vector.extract_strided_slice %34 {offsets = [0, 96], sizes = [8, 32], strides = [1, 1]} : vector<8x384xbf16> to vector<8x32xbf16>
    %93 = vector.extract_strided_slice %34 {offsets = [0, 224], sizes = [8, 32], strides = [1, 1]} : vector<8x384xbf16> to vector<8x32xbf16>
    %94 = vector.extract_strided_slice %34 {offsets = [0, 352], sizes = [8, 32], strides = [1, 1]} : vector<8x384xbf16> to vector<8x32xbf16>
    %cst_27 = arith.constant dense<0.000000e+00> : vector<8x8xf32>
    %95 = tpu.matmul %92, %93, %cst_27 {dimension_numbers = #tpu.dot_dimension_numbers<[1], [1], [0], [0], [0, 0, 1, 0], [], []>} : vector<8x32xbf16>, vector<8x32xbf16>, vector<8x8xf32> -> vector<8x8xf32>
    %96 = arith.addf %95, %40 : vector<8x8xf32>
    %cst_28 = arith.constant dense<0xFF800000> : vector<8xf32>
    %97 = vector.multi_reduction <maximumf>, %96, %cst_28 [1] : vector<8x8xf32> to vector<8xf32>
    %98 = vector.shape_cast %97 : vector<8xf32> to vector<8x1xf32>
    %99 = vector.broadcast %98 : vector<8x1xf32> to vector<8x8xf32>
    %100 = arith.subf %96, %99 : vector<8x8xf32>
    %101 = math.exp %100 : vector<8x8xf32>
    %cst_29 = arith.constant dense<0.000000e+00> : vector<8xf32>
    %102 = vector.multi_reduction <add>, %101, %cst_29 [1] : vector<8x8xf32> to vector<8xf32>
    %103 = vector.shape_cast %102 : vector<8xf32> to vector<8x1xf32>
    %104 = tpu.reciprocal %103 {approx = true} : vector<8x1xf32> -> vector<8x1xf32>
    %105 = vector.broadcast %104 : vector<8x1xf32> to vector<8x8xf32>
    %106 = arith.mulf %101, %105 : vector<8x8xf32>
    %107 = arith.truncf %106 : vector<8x8xf32> to vector<8x8xbf16>
    %cst_30 = arith.constant dense<0.000000e+00> : vector<8x32xf32>
    %108 = tpu.matmul %107, %94, %cst_30 {dimension_numbers = #tpu.dot_dimension_numbers<[1], [0], [0], [1], [0, 0, 1, 1], [], []>} : vector<8x8xbf16>, vector<8x32xbf16>, vector<8x32xf32> -> vector<8x32xf32>
    %109 = tpu.concatenate %57, %74, %91, %108 in 1 : vector<8x32xf32>, vector<8x32xf32>, vector<8x32xf32>, vector<8x32xf32> -> vector<8x128xf32>
    %110 = arith.truncf %109 : vector<8x128xf32> to vector<8x128xbf16>
    %c0_31 = arith.constant 0 : index
    %c0_32 = arith.constant 0 : index
    %c0_33 = arith.constant 0 : index
    %111 = vector.load %arg6[%c0_31, %c0_32, %c0_33] : memref<1x128x128xbf16, #tpu.memory_space<vmem>>, vector<1x128x128xbf16>
    %112 = vector.shape_cast %111 : vector<1x128x128xbf16> to vector<128x128xbf16>
    %cst_34 = arith.constant dense<0.000000e+00> : vector<8x128xf32>
    %113 = tpu.matmul %110, %112, %cst_34 {dimension_numbers = #tpu.dot_dimension_numbers<[1], [0], [0], [1], [0, 0, 1, 1], [], []>} : vector<8x128xbf16>, vector<128x128xbf16>, vector<8x128xf32> -> vector<8x128xf32>
    %114 = arith.addf %3, %113 : vector<8x128xf32>
    %115 = vector.extract_strided_slice %5 {offsets = [2, 0], sizes = [1, 128], strides = [1, 1]} : vector<8x128xf32> to vector<1x128xf32>
    %116 = vector.broadcast %115 : vector<1x128xf32> to vector<8x128xf32>
    %117 = arith.addf %114, %116 : vector<8x128xf32>
    %118 = vector.extract_strided_slice %5 {offsets = [3, 0], sizes = [1, 128], strides = [1, 1]} : vector<8x128xf32> to vector<1x128xf32>
    %119 = vector.extract_strided_slice %5 {offsets = [4, 0], sizes = [1, 128], strides = [1, 1]} : vector<8x128xf32> to vector<1x128xf32>
    %cst_35 = arith.constant dense<0.000000e+00> : vector<8xf32>
    %120 = vector.multi_reduction <add>, %117, %cst_35 [1] : vector<8x128xf32> to vector<8xf32>
    %121 = vector.shape_cast %120 : vector<8xf32> to vector<8x1xf32>
    %cst_36 = arith.constant 1.280000e+02 : f32
    %122 = vector.broadcast %cst_36 : f32 to vector<8x1xf32>
    %123 = arith.divf %121, %122 : vector<8x1xf32>
    %124 = arith.mulf %117, %117 : vector<8x128xf32>
    %cst_37 = arith.constant dense<0.000000e+00> : vector<8xf32>
    %125 = vector.multi_reduction <add>, %124, %cst_37 [1] : vector<8x128xf32> to vector<8xf32>
    %126 = vector.shape_cast %125 : vector<8xf32> to vector<8x1xf32>
    %cst_38 = arith.constant 1.280000e+02 : f32
    %127 = vector.broadcast %cst_38 : f32 to vector<8x1xf32>
    %128 = arith.divf %126, %127 : vector<8x1xf32>
    %129 = arith.mulf %123, %123 : vector<8x1xf32>
    %130 = arith.subf %128, %129 : vector<8x1xf32>
    %131 = vector.broadcast %123 : vector<8x1xf32> to vector<8x128xf32>
    %132 = arith.subf %117, %131 : vector<8x128xf32>
    %cst_39 = arith.constant 9.99999974E-6 : f32
    %133 = vector.broadcast %cst_39 : f32 to vector<8x1xf32>
    %134 = arith.addf %130, %133 : vector<8x1xf32>
    %135 = math.rsqrt %134 : vector<8x1xf32>
    %136 = vector.broadcast %135 : vector<8x1xf32> to vector<8x128xf32>
    %137 = arith.mulf %132, %136 : vector<8x128xf32>
    %138 = vector.broadcast %118 : vector<1x128xf32> to vector<8x128xf32>
    %139 = arith.mulf %137, %138 : vector<8x128xf32>
    %140 = vector.broadcast %119 : vector<1x128xf32> to vector<8x128xf32>
    %141 = arith.addf %139, %140 : vector<8x128xf32>
    %142 = arith.truncf %141 : vector<8x128xf32> to vector<8x128xbf16>
    %c0_40 = arith.constant 0 : index
    %c0_41 = arith.constant 0 : index
    %c0_42 = arith.constant 0 : index
    %143 = vector.load %arg7[%c0_40, %c0_41, %c0_42] : memref<1x128x512xbf16, #tpu.memory_space<vmem>>, vector<1x128x512xbf16>
    %144 = vector.shape_cast %143 : vector<1x128x512xbf16> to vector<128x512xbf16>
    %cst_43 = arith.constant dense<0.000000e+00> : vector<8x512xf32>
    %145 = tpu.matmul %142, %144, %cst_43 {dimension_numbers = #tpu.dot_dimension_numbers<[1], [0], [0], [1], [0, 0, 1, 1], [], []>} : vector<8x128xbf16>, vector<128x512xbf16>, vector<8x512xf32> -> vector<8x512xf32>
    %c0_44 = arith.constant 0 : index
    %c0_45 = arith.constant 0 : index
    %c0_46 = arith.constant 0 : index
    %146 = vector.load %arg10[%c0_44, %c0_45, %c0_46] : memref<1x1x512xf32, #tpu.memory_space<vmem>>, vector<1x1x512xf32>
    %147 = vector.shape_cast %146 : vector<1x1x512xf32> to vector<1x512xf32>
    %148 = vector.broadcast %147 : vector<1x512xf32> to vector<8x512xf32>
    %149 = arith.addf %145, %148 : vector<8x512xf32>
    %cst_47 = arith.constant 0.000000e+00 : f32
    %150 = vector.broadcast %cst_47 : f32 to vector<8x512xf32>
    %151 = arith.maximumf %149, %150 : vector<8x512xf32>
    %152 = arith.truncf %151 : vector<8x512xf32> to vector<8x512xbf16>
    %c0_48 = arith.constant 0 : index
    %c0_49 = arith.constant 0 : index
    %c0_50 = arith.constant 0 : index
    %153 = vector.load %arg8[%c0_48, %c0_49, %c0_50] : memref<1x512x128xbf16, #tpu.memory_space<vmem>>, vector<1x512x128xbf16>
    %154 = vector.shape_cast %153 : vector<1x512x128xbf16> to vector<512x128xbf16>
    %cst_51 = arith.constant dense<0.000000e+00> : vector<8x128xf32>
    %155 = tpu.matmul %152, %154, %cst_51 {dimension_numbers = #tpu.dot_dimension_numbers<[1], [0], [0], [1], [0, 0, 1, 1], [], []>} : vector<8x512xbf16>, vector<512x128xbf16>, vector<8x128xf32> -> vector<8x128xf32>
    %156 = arith.addf %117, %155 : vector<8x128xf32>
    %157 = vector.extract_strided_slice %5 {offsets = [5, 0], sizes = [1, 128], strides = [1, 1]} : vector<8x128xf32> to vector<1x128xf32>
    %158 = vector.broadcast %157 : vector<1x128xf32> to vector<8x128xf32>
    %159 = arith.addf %156, %158 : vector<8x128xf32>
    %c0_52 = arith.constant 0 : index
    %c0_53 = arith.constant 0 : index
    %160 = vector.load %arg14[%c0_52, %c0_53] : memref<8x128xf32, #tpu.memory_space<vmem>>, vector<8x128xf32>
    tpu.vector_store %arg14[%c0_52, %c0_53], %159 {strides = array<i32>} : memref<8x128xf32, #tpu.memory_space<vmem>>, vector<8x128xf32>,
    %c1_i32 = arith.constant 1 : i32
    %161 = arith.cmpi eq, %arg1, %c1_i32 : i32
    %162 = arith.extui %161 : i1 to i32
    %c0_i32_54 = arith.constant 0 : i32
    %163 = arith.cmpi ne, %162, %c0_i32_54 : i32
    scf.if %163 {
      %164 = arith.truncf %159 : vector<8x128xf32> to vector<8x128xbf16>
      %c0_55 = arith.constant 0 : index
      %c0_56 = arith.constant 0 : index
      %165 = vector.load %arg11[%c0_55, %c0_56] : memref<128x128xbf16, #tpu.memory_space<vmem>>, vector<128x128xbf16>
      %cst_57 = arith.constant dense<0.000000e+00> : vector<8x128xf32>
      %166 = tpu.matmul %164, %165, %cst_57 {dimension_numbers = #tpu.dot_dimension_numbers<[1], [0], [0], [1], [0, 0, 1, 1], [], []>} : vector<8x128xbf16>, vector<128x128xbf16>, vector<8x128xf32> -> vector<8x128xf32>
      %c0_58 = arith.constant 0 : index
      %c0_59 = arith.constant 0 : index
      %167 = vector.load %arg12[%c0_58, %c0_59] : memref<1x128xf32, #tpu.memory_space<vmem>>, vector<1x128xf32>
      %168 = vector.broadcast %167 : vector<1x128xf32> to vector<8x128xf32>
      %169 = arith.addf %166, %168 : vector<8x128xf32>
      %c0_60 = arith.constant 0 : index
      %c0_61 = arith.constant 0 : index
      %170 = vector.load %arg13[%c0_60, %c0_61] : memref<8x128xf32, #tpu.memory_space<vmem>>, vector<8x128xf32>
      tpu.vector_store %arg13[%c0_60, %c0_61], %169 {strides = array<i32>} : memref<8x128xf32, #tpu.memory_space<vmem>>, vector<8x128xf32>,
    } else {
    }
    return
  }
  func.func @transform_0(%arg0: i32, %arg1: i32) -> (i32, i32) {
    %c0_i32 = arith.constant 0 : i32
    %c0_i32_0 = arith.constant 0 : i32
    return %arg0, %c0_i32 : i32, i32
  }
  func.func @transform_1(%arg0: i32, %arg1: i32) -> (i32, i32) {
    %c0_i32 = arith.constant 0 : i32
    %c0_i32_0 = arith.constant 0 : i32
    %c0_i32_1 = arith.constant 0 : i32
    return %c0_i32, %c0_i32_0 : i32, i32
  }
  func.func @transform_2(%arg0: i32, %arg1: i32) -> (i32, i32) {
    %c0_i32 = arith.constant 0 : i32
    %c0_i32_0 = arith.constant 0 : i32
    %c0_i32_1 = arith.constant 0 : i32
    return %c0_i32, %c0_i32_0 : i32, i32
  }
  func.func @transform_3(%arg0: i32, %arg1: i32) -> (i32, i32, i32) {
    %c0_i32 = arith.constant 0 : i32
    %c0_i32_0 = arith.constant 0 : i32
    %c0_i32_1 = arith.constant 0 : i32
    return %arg1, %c0_i32, %c0_i32_0 : i32, i32, i32
  }
  func.func @transform_4(%arg0: i32, %arg1: i32) -> (i32, i32, i32) {
    %c0_i32 = arith.constant 0 : i32
    %c0_i32_0 = arith.constant 0 : i32
    %c0_i32_1 = arith.constant 0 : i32
    return %arg1, %c0_i32, %c0_i32_0 : i32, i32, i32
  }
  func.func @transform_5(%arg0: i32, %arg1: i32) -> (i32, i32, i32) {
    %c0_i32 = arith.constant 0 : i32
    %c0_i32_0 = arith.constant 0 : i32
    %c0_i32_1 = arith.constant 0 : i32
    return %arg1, %c0_i32, %c0_i32_0 : i32, i32, i32
  }
  func.func @transform_6(%arg0: i32, %arg1: i32) -> (i32, i32, i32) {
    %c0_i32 = arith.constant 0 : i32
    %c0_i32_0 = arith.constant 0 : i32
    %c0_i32_1 = arith.constant 0 : i32
    return %arg1, %c0_i32, %c0_i32_0 : i32, i32, i32
  }
  func.func @transform_7(%arg0: i32, %arg1: i32) -> (i32, i32, i32) {
    %c0_i32 = arith.constant 0 : i32
    %c0_i32_0 = arith.constant 0 : i32
    %c0_i32_1 = arith.constant 0 : i32
    return %arg1, %c0_i32, %c0_i32_0 : i32, i32, i32
  }
  func.func @transform_8(%arg0: i32, %arg1: i32) -> (i32, i32, i32) {
    %c0_i32 = arith.constant 0 : i32
    %c0_i32_0 = arith.constant 0 : i32
    %c0_i32_1 = arith.constant 0 : i32
    return %arg1, %c0_i32, %c0_i32_0 : i32, i32, i32
  }
  func.func @transform_9(%arg0: i32, %arg1: i32) -> (i32, i32) {
    %c0_i32 = arith.constant 0 : i32
    %c0_i32_0 = arith.constant 0 : i32
    %c0_i32_1 = arith.constant 0 : i32
    return %c0_i32, %c0_i32_0 : i32, i32
  }
  func.func @transform_10(%arg0: i32, %arg1: i32) -> (i32, i32) {
    %c0_i32 = arith.constant 0 : i32
    %c0_i32_0 = arith.constant 0 : i32
    %c0_i32_1 = arith.constant 0 : i32
    return %c0_i32, %c0_i32_0 : i32, i32
  }
  func.func @transform_11(%arg0: i32, %arg1: i32) -> (i32, i32) {
    %c0_i32 = arith.constant 0 : i32
    %c0_i32_0 = arith.constant 0 : i32
    return %arg0, %c0_i32 : i32, i32
  }
}

</mosaic_0001>

<bundles_post_ra>
// kernel: forward.1
= control target key start
LH: loop header
LB: loop body
LE: loop exit
PB: predicated region body
PF: predicated region fallthrough
CT: control target
= control target key end

     0   :  { %s4074_s0 = inlined_call_operand.vmem [shape: s32[16,1], index: 0, kind: input, shape index: {}]   ;;  %s4075_s1 = inlined_call_operand.hbm [shape: bf16[128,128], index: 1, kind: input, shape index: {}]   ;;  %s4076_s2 = inlined_call_operand.vmem [shape: f32[8,128], index: 2, kind: input, shape index: {}]   ;;  %s4077_s3 = inlined_call_operand.hbm [shape: bf16[2,128,384], index: 3, kind: input, shape index: {}]   ;;  %s4078_s4 = inlined_call_operand.hbm [shape: bf16[2,128,128], index: 4, kind: input, shape index: {}]   ;;  %s4079_s5 = inlined_call_operand.hbm [shape: bf16[2,128,512], index: 5, kind: input, shape index: {}]   ;;  %s4080_s6 = inlined_call_operand.hbm [shape: bf16[2,512,128], index: 6, kind: input, shape index: {}]   ;;  %s4081_s7 = inlined_call_operand.vmem [shape: f32[2,8,128], index: 7, kind: input, shape index: {}]   ;;  %s4082_s8 = inlined_call_operand.vmem [shape: f32[2,1,512], index: 8, kind: input, shape index: {}]   ;;  %s4083_s9 = inlined_call_operand.hbm [shape: bf16[128,128], index: 9, kind: input, shape index: {}]   ;;  %s4084_s10 = inlined_call_operand.vmem [shape: f32[1,128], index: 10, kind: input, shape index: {}]   ;;  %s4085_s11 = inlined_call_operand.vmem [shape: f32[16,128], index: 11, kind: output, shape index: {}]  }
   0x1   :  { %4092 = sst [smem:[#allocation23_spill]] %s4075_s1 }
   0x2   :  { %4093 = sst [smem:[#allocation24_spill]] %s4076_s2 }
   0x3   :  { %4094 = sst [smem:[#allocation25_spill]] %s4077_s3 }
   0x4   :  { %4095 = sst [smem:[#allocation26_spill]] %s4079_s5 }
   0x5   :  { %4096 = sst [smem:[#allocation27_spill]] %s4080_s6 }
   0x6   :  { %4097 = sst [smem:[#allocation28_spill]] %s4081_s7 }
   0x7   :  { %4098 = sst [smem:[#allocation29_spill]] %s4082_s8 }
   0x8   :  { %4099 = sst [smem:[#allocation30_spill]] %s4084_s10 }
   0x9   :  { %4100 = sst [smem:[#allocation31_spill]] %s4085_s11 }
   0xa   :  { %16 = vsyncpa [#allocation4], 0 }
   0xb   :  { %17 = vsyncpa [#allocation6], 0 }
   0xc   :  { %19 = vsyncpa [#allocation6 + $0x1], 0 }
   0xd   :  { %20 = vsyncpa [#allocation9], 0 }
   0xe   :  { %22 = vsyncpa [#allocation9 + $0x1], 0 }
   0xf   :  { %23 = vsyncpa [#allocation12], 0  ;;  %s3559_s17 = smov 0   ;;  %s3561_s18 = smov 0  }
  0x10   :  { %s3563_s19 = smov 0   ;;  %s3565_s20 = smov 0  }
  0x11   :  { %s3567_s21 = smov 0   ;;  %s3569_s22 = smov 0  }
  0x12   :  { %s3571_s23 = smov 0   ;;  %s3573_s24 = smov 0  }
  0x13 LB: > { %4101 = sst [smem:[#allocation17_spill]] %s3452_s19  ;;  %s38_s25 = sadd.s32 1, %s3464_s22  ;;  %s3472_s24 = sphi %s3573_s24, %s29_s24   ;;  %s3468_s23 = sphi %s3571_s23, %s4129_s23   ;;  %s3464_s22 = sphi %s3569_s22, %s4128_s22   ;;  %s3460_s21 = sphi %s3567_s21, %s4127_s21   ;;  %s3456_s20 = sphi %s3565_s20, %s4126_s20   ;;  %s3452_s19 = sphi %s3563_s19, %s4125_s19   ;;  %s3448_s18 = sphi %s3561_s18, %s4131_s18   ;;  %s3444_s17 = sphi %s3559_s17, %s4130_s17  }
  0x14   : > { %4102 = sst [smem:[#allocation18_spill]] %s3464_s22  ;;  %s41_s26 = sadd.s32 1, %s3468_s23 }
  0x15   : > { %4103 = sst [smem:[#allocation19_spill]] %s3468_s23  ;;  %p39_p0 = scmp.ge.s32.totalorder %s38_s25, 2 }
  0x16   : > { %s116_s27 = sadd.s32 1, %s3452_s19  ;;  %p123_p1 = scmp.ne.s32.totalorder %s3452_s19, %s3448_s18 }
  0x17   : > { %p124_p2 = scmp.eq.s32.totalorder %s3472_s24, 0  ;;  %s4133_s25 = smov (%p39_p0, %s38_s25), 0 }
  0x18   : > { %4104 = sst [smem:[#allocation20_spill]] %s4133_s25  ;;  %s4135_s26 = smov (!%p39_p0, %s41_s26), %s3468_s23 }
  0x19   : > { %s113_s28 = ssub.s32 %s3464_s22, %s4133_s25  ;;  %p125_p3 = por %p124_p2, %p123_p1 }
  0x1a   : > { %p43_p4 = scmp.ge.s32.totalorder %s4135_s26, 2  ;;  %p114_p5 = scmp.eq.s32.totalorder %s113_s28, 0 }
  0x1b   : > { %p2985_p6 = scmp.lt.s32.totalorder %s3472_s24, 4  ;;  %s4089_s30 = sand.u32 1, %s3472_s24  }
  0x1c   : > { %s4137_s26 = smov (%p43_p4, %s4135_s26), 0  ;;  %s3618_s12 = sand.u32 1, %s3452_s19  }
  0x1d   : > { %4105 = sst [smem:[#allocation21_spill]] %s4137_s26  ;;  %s2944_s13 = smul.u32 192, %s3618_s12 }
  0x1e   : > { %s3614_s29 = scalar_select %p114_p5, %s3452_s19, %s116_s27  }
  0x1f   : > { %s2945_s14 = smul.u32 3072, %s3464_s22  ;;  %p3622_p7 = pnand %p2985_p6, %p125_p3 }
  0x20   : > { %4106 = sst [smem:[#allocation22_spill]] %s3614_s29  ;;  %s394_s23 = scalar_lea.vmem [#allocation5], %s2944_s13 }
  0x21   : > { %s4108_s3 = sld [smem:[#allocation25_spill]]  ;;  %s401_s26 = sshll.u32 %s394_s23, 4  ;;  %s402_s26 = int_to_ptr.vmem [resolvable:$true] %s401_s26 }
  0x22   : > { %s3631_s27 = scalar_lea.sflag [#allocation6], %s4089_s30  ;;  %p3232_p8 = pneg %p3622_p7 }
  0x23   : > { %s3243_s29 = scalar_lea.vmem %s402_s26, 3072  ;;  %s3474_s19 = smov [#allocation5]  }
  0x24   : > { %p3244_p9 = scmp.ne.s32.totalorder %s402_s26, %s3243_s29  ;;  %s3248_s10 = sshll.u32 %s3474_s19, 4  ;;  %s3249_s10 = int_to_ptr.vmem [resolvable:$false] %s3248_s10 }
  0x25   : > { %s3250_s25 = scalar_lea.vmem %s3249_s10, 6144  ;;  %p3251_p12 = scmp.lt.s32.totalorder %s402_s26, %s3249_s10 }
  0x26   : > { %p3246_p10 = pnand %p3244_p9, %p3232_p8  ;;  %p3252_p13 = scmp.lt.s32.totalorder %s3250_s25, %s3243_s29 }
  0x27   : > { %s400_s28 = scalar_lea.hbm %s4108_s3, %s2945_s14 }
  0x28   : > { %p3247_p11 = pneg %p3246_p10  ;;  %p3253_p0 = por %p3252_p13, %p3251_p12 }
  0x2a   : > { %p3254_p1 = pnand %p3253_p0, %p3247_p11 }
  0x2c   : > { %3257 = shalt.err (!%p3254_p1)
}
  0x2d   : > { %s3475_s23 = smov 192   ;;  %s3476_s13 = smov 12  }
  0x2e   : > { %2973 = dma.hbm_to_vmem [thread:$0]  (!%p3622_p7), %s400_s28, 3072, %s402_s26, %s3631_s27, %s3475_s23, %s3475_s23, %s3476_s13  }
  0x2f   : > { %s2573_s14 = sshll.u32 %s3618_s12, 8  ;;  %s2718_s16 = sshll.u32 %s3464_s22, 12 }
  0x30   : > { %s4109_s5 = sld [smem:[#allocation26_spill]]  ;;  %s436_s29 = scalar_lea.vmem [#allocation8], %s2573_s14 }
  0x31   : > { %s443_s25 = sshll.u32 %s436_s29, 4  ;;  %s4110_s3 = sand.u32 1, %s3472_s24   ;;  %s444_s25 = int_to_ptr.vmem [resolvable:$true] %s443_s25 }
  0x32   : > { %s3648_s2 = scalar_lea.sflag [#allocation9], %s4110_s3  ;;  %s3271_s11 = scalar_lea.vmem %s444_s25, 4096 }
  0x33   : > { %p3272_p2 = scmp.ne.s32.totalorder %s444_s25, %s3271_s11  ;;  %s3477_s8 = smov [#allocation8]  }
  0x34   : > { %s3276_s26 = sshll.u32 %s3477_s8, 4  ;;  %s3277_s26 = int_to_ptr.vmem [resolvable:$false] %s3276_s26 }
  0x35   : > { %p3274_p3 = pnand %p3272_p2, %p3232_p8  ;;  %s3278_s28 = scalar_lea.vmem %s3277_s26, 8192 }
  0x36   : > { %s442_s10 = scalar_lea.hbm %s4109_s5, %s2718_s16  ;;  %p3279_p5 = scmp.lt.s32.totalorder %s444_s25, %s3277_s26 }
  0x37   : > { %p3275_p4 = pneg %p3274_p3  ;;  %p3280_p6 = scmp.lt.s32.totalorder %s3278_s28, %s3271_s11 }
  0x39   : > { %p3281_p9 = por %p3280_p6, %p3279_p5 }
  0x3b   : > { %p3282_p10 = pnand %p3281_p9, %p3275_p4 }
  0x3d   : > { %3285 = shalt.err (!%p3282_p10)
}
  0x3e   : > { %s3478_s30 = smov 256   ;;  %s3479_s3 = smov 16  }
  0x3f   : > { %2979 = dma.hbm_to_vmem [thread:$0]  (!%p3622_p7), %s442_s10, 4096, %s444_s25, %s3648_s2, %s3478_s30, %s3478_s30, %s3479_s3  }
  0x40   : > { %s4111_s6 = sld [smem:[#allocation27_spill]]  ;;  %s457_s13 = scalar_lea.vmem [#allocation10], %s2573_s14 }
  0x41   : > { %s464_s19 = sshll.u32 %s457_s13, 4  ;;  %s4090_s29 = sadd.s32 4294967295, %s3472_s24   ;;  %s3661_s19 = int_to_ptr.vmem [resolvable:$true] %s464_s19 }
  0x42   : > { %p129_p11 = scmp.ne.s32.totalorder %s3448_s18, %s3444_s17  ;;  %p3668_p12 = scmp.eq.s32.totalorder %s4090_s29, 0 }
  0x43   : > { %p2565_p13 = scmp.ge.s32.totalorder %s3472_s24, 1  ;;  %p338_p0 = scmp.lt.s32.totalorder %s3472_s24, 5 }
  0x44   : > { %p3676_p1 = por %p3668_p12, %p129_p11  ;;  %s3480_s17 = smov [#allocation3]  }
  0x45   : > { %p3680_p2 = pnand %p2565_p13, %p338_p0  ;;  %s350_s10 = sshll.u32 %s3480_s17, 4  ;;  %s351_s10 = int_to_ptr.vmem [resolvable:$true] %s350_s10 }
  0x46   : > { %s3659_s11 = scalar_lea.hbm %s4111_s6, %s2718_s16  ;;  %s3481_s30 = smov [#allocation11]  }
  0x47   : > { %p2963_p3 = pneg %p3680_p2  ;;  %s366_s3 = sshll.u32 %s3481_s30, 4  ;;  %s367_s3 = int_to_ptr.vmem [resolvable:$true] %s366_s3 }
  0x48   : > { %s2717_s8 = sshll.u32 %s3464_s22, 10  ;;  %s3297_s23 = scalar_lea.vmem %s351_s10, 1024 }
  0x49   : > { %p3689_p4 = pnand %p2963_p3, %p3668_p12  ;;  %p3298_p6 = scmp.ne.s32.totalorder %s351_s10, %s3297_s23 }
  0x4a   : > { %p3305_p11 = scmp.lt.s32.totalorder %s351_s10, %s351_s10  ;;  %p3306_p13 = scmp.lt.s32.totalorder %s3297_s23, %s3297_s23 }
  0x4b   : > { %p3288_p5 = pneg %p3689_p4 }
  0x4c   : > { %p3307_p0 = por %p3306_p13, %p3305_p11 }
  0x4d   : > { %p3300_p9 = pnand %p3298_p6, %p3288_p5 }
  0x4f   : > { %p3301_p10 = pneg %p3300_p9 }
  0x51   : > { %p3308_p3 = pnand %p3307_p0, %p3301_p10 }
  0x53   : > { %3311 = shalt.err (!%p3308_p3)
}
  0x54   : > { %s3482_s13 = smov 64   ;;  %s3483_s17 = smov 4  }
  0x55   : > { %s4116_s1 = sld [smem:[#allocation23_spill]]  ;;  %s3323_s25 = scalar_lea.vmem %s367_s3, 1024 }
  0x56   : > { %p3324_p6 = scmp.ne.s32.totalorder %s367_s3, %s3323_s25  ;;  %p3331_p10 = scmp.lt.s32.totalorder %s367_s3, %s367_s3 }
  0x57   : > { %p3332_p13 = scmp.lt.s32.totalorder %s3323_s25, %s3323_s25 }
  0x58   : > { %p3326_p9 = pnand %p3324_p6, %p3288_p5 }
  0x59   : > { %p3333_p0 = por %p3332_p13, %p3331_p10 }
  0x5a   : > { %p3327_p11 = pneg %p3326_p9 }
  0x5b   : > { %2966 = dma.hbm_to_vmem [thread:$0]  (!%p3689_p4), %s4116_s1, 1024, %s351_s10, [#allocation4], %s3482_s13, %s3482_s13, %s3483_s17  }
  0x5c   : > { %p3334_p3 = pnand %p3333_p0, %p3327_p11 }
  0x5e   : > { %3337 = shalt.err (!%p3334_p3)
}
  0x5f   : > { %2969 = dma.hbm_to_vmem [thread:$0]  (!%p3689_p4), %s4083_s9, 1024, %s367_s3, [#allocation12], %s3482_s13, %s3482_s13, %s3483_s17  }
  0x60   : > { %s421_s30 = scalar_lea.hbm %s4078_s4, %s2717_s8  ;;  %s4117_s1 = sshll.u32 %s3618_s12, 6 }
  0x61   : > { %s415_s25 = scalar_lea.vmem [#allocation7], %s4117_s1  ;;  %s3484_s28 = smov [#allocation7]  }
  0x62   : > { %s422_s6 = sshll.u32 %s415_s25, 4  ;;  %s3356_s7 = sshll.u32 %s3484_s28, 4  ;;  %s423_s6 = int_to_ptr.vmem [resolvable:$true] %s422_s6  ;;  %s3357_s7 = int_to_ptr.vmem [resolvable:$false] %s3356_s7 }
  0x63   : > { %s3351_s22 = scalar_lea.vmem %s423_s6, 1024  ;;  %s3358_s5 = scalar_lea.vmem %s3357_s7, 2048 }
  0x64   : > { %p3352_p5 = scmp.ne.s32.totalorder %s423_s6, %s3351_s22  ;;  %p3359_p11 = scmp.lt.s32.totalorder %s423_s6, %s3357_s7 }
  0x65   : > { %p3360_p4 = scmp.lt.s32.totalorder %s3358_s5, %s3351_s22 }
  0x66   : > { %p3354_p6 = pnand %p3352_p5, %p3232_p8 }
  0x67   : > { %p3361_p10 = por %p3360_p4, %p3359_p11 }
  0x68   : > { %p3355_p9 = pneg %p3354_p6 }
  0x6a   : > { %p3362_p13 = pnand %p3361_p10, %p3355_p9 }
  0x6c   : > { %3365 = shalt.err (!%p3362_p13)
}
  0x6d   : > { %2976 = dma.hbm_to_vmem [thread:$0]  (!%p3622_p7), %s421_s30, 1024, %s423_s6, %s3631_s27, %s3482_s13, %s3482_s13, %s3483_s17  }
  0x6e   : > { %s3379_s1 = scalar_lea.vmem %s3661_s19, 4096  ;;  %s3485_s7 = smov [#allocation10]  }
  0x6f   : > { %p3380_p0 = scmp.ne.s32.totalorder %s3661_s19, %s3379_s1  ;;  %s3384_s22 = sshll.u32 %s3485_s7, 4  ;;  %s3385_s22 = int_to_ptr.vmem [resolvable:$false] %s3384_s22 }
  0x70   : > { %s3386_s12 = scalar_lea.vmem %s3385_s22, 8192  ;;  %p3387_p6 = scmp.lt.s32.totalorder %s3661_s19, %s3385_s22 }
  0x71   : > { %p3382_p3 = pnand %p3380_p0, %p3232_p8  ;;  %p3388_p9 = scmp.lt.s32.totalorder %s3386_s12, %s3379_s1 }
  0x73   : > { %p3383_p5 = pneg %p3382_p3  ;;  %p3389_p11 = por %p3388_p9, %p3387_p6 }
  0x75   : > { %p3390_p4 = pnand %p3389_p11, %p3383_p5 }
  0x77   : > { %3393 = shalt.err (!%p3390_p4)
}
  0x78   : > { %2982 = dma.hbm_to_vmem [thread:$0]  (!%p3622_p7), %s3659_s11, 4096, %s3661_s19, %s3648_s2, %s3482_s13, %s3482_s13, %s3483_s17  }
  0x79   : > { %490 = sbr.rel (%p3680_p2) target bundleno = 3211 (0xc8b), region = 64 }
  0x7e   : > { %3427 = dma.done.wait (%p3668_p12), [#allocation4], 1024  }
  0x7f   : > { %3429 = vsyncadd (%p3668_p12), [#allocation4], 4294966272  ;;  %s4118_s6 = sadd.s32 4294967295, %s3472_s24   ;;  %s498_s27 = sand.u32 1, %s3448_s18  }
  0x80   : > { %s496_s15 = sand.u32 1, %s4118_s6   ;;  %s2946_s3 = smul.u32 192, %s498_s27 }
  0x81   : > { %s497_s8 = scalar_lea.sflag [#allocation6], %s496_s15 }
  0x82   : > { %s3755_s23 = scalar_lea.vmem [#allocation5], %s2946_s3 }
  0x83   : > { %3431 = dma.done.wait (%p3676_p1), %s497_s8, 4096  }
  0x84   : > { %3433 = vsyncadd (%p3676_p1), %s497_s8, 4294963200  ;;  %s2581_s2 = sshll.u32 %s498_s27, 6  ;;  %s2582_s11 = sshll.u32 %s498_s27, 8 }
  0x85   : > { %s3761_s19 = scalar_lea.vmem [#allocation7], %s2581_s2  ;;  %s515_s14 = scalar_lea.sflag [#allocation9], %s496_s15 }
  0x86   : > { %s3763_s13 = scalar_lea.vmem [#allocation8], %s2582_s11 }
  0x87   : > { %3435 = dma.done.wait (%p3676_p1), %s515_s14, 8192  }
  0x88   : > { %3437 = vsyncadd (%p3676_p1), %s515_s14, 4294959104  ;;  %s3769_s17 = scalar_lea.vmem [#allocation10], %s2582_s11 }
  0x89   : > { %3439 = dma.done.wait (%p3668_p12), [#allocation12], 1024  }
  0x8a   : > { %3441 = vsyncadd (%p3668_p12), [#allocation12], 4294966272  ;;  %p596_p7 = scmp.lt.s32.totalorder %s3460_s21, 1  ;;  %p600_p8 = scmp.lt.s32.totalorder %s3456_s20, 1 }
  0x8b   : > { %s4119_s7 = sld [smem:[#allocation28_spill]]  ;;  %p2589_p12 = scmp.ne.s32.totalorder %s3456_s20, 0 }
  0x8c   : > { %s4139_s21 = smov (!%p596_p7, %s3460_s21), 1  ;;  %s4120_s15 = sld [smem:[#allocation29_spill]] }
  0x8d   : > { %s601_s29 = scalar_select %p600_p8, %s3456_s20, 1 }
  0x8e   : > { %s2585_s10 = sshll.u32 %s4139_s21, 3  ;;  %s4121_s2 = sld [smem:[#allocation31_spill]] }
  0x8f   : > { %s599_s25 = scalar_lea.vmem %s4074_s0, %s2585_s10  ;;  %s2586_s28 = sshll.u32 %s601_s29, 3 }
  0x90   : > { %s2587_s26 = sshll.u32 %s601_s29, 2  ;;  %616 = sbr.rel (%p2589_p12) target bundleno = 476 (0x1dc), region = 92 }
  0x91   : > { %s3785_s22 = scalar_lea.vmem %s4119_s7, %s2586_s28  ;;  %s4122_s29 = sld [smem:[#allocation24_spill]] (!%p2589_p12) }
  0x92   : > { %s3790_s27 = scalar_lea.vmem %s4120_s15, %s2587_s26 }
  0x94   : > { %s3795_s21 = scalar_lea.vmem %s4121_s2, %s2585_s10 }
  0x95   : > { %v617_v0 = vld [vmem:[%s599_s25] sm:$0xff]  ;;  %v3486_v2 = vmov 0   ;;  %v3487_v3 = vmov 0.0   ;;  %v3075_v4 = vld [vmem:[#allocation3 + $0x30] sm:$0xff]   ;;  %vm3488_vm0 = vmmov 0   ;;  %v3076_v5 = vld [vmem:[#allocation3 + $0x28] sm:$0xff]   ;;  %v618_v11 = vlaneseq }
  0x96   : > { %v3074_v1 = vld [vmem:[#allocation3 + $0x38] sm:$0xff]   ;;  %3073 = vset.pattern.permute.xlu0 %v3486_v2  ;;  %2816 = vmatprep.subr.bf16.mxu0 %v3487_v3  ;;  %v3077_v6 = vld [vmem:[#allocation3 + $0x20] sm:$0xff]   ;;  %v3079_v8 = vld [vmem:[#allocation3 + $0x10] sm:$0xff]   ;;  %v3489_v14 = vmov 1.0|1.0  }
  0x97   : > { %621 = vperm.xlu0 %3073, %v617_v0   ;;  %2817 = vmatpush3.bf16.msra.mxu0 %v3074_v1  ;;  %v3078_v7 = vld [vmem:[#allocation3 + $0x18] sm:$0xff]   ;;  %v3080_v9 = vld [vmem:[#allocation3 + $0x8] sm:$0xff]   ;;  %v3081_v10 = vld [vmem:[#allocation3] sm:$0xff]   ;;  %v619_v12 = vand.u32 127, %v618_v11 }
  0x98   : > { %2818 = vmatprep.subr.bf16.mxu0 %v3487_v3  ;;  %2832 = vmatprep.mubr.msk.bf16.mxu0 %vm3488_vm0, %v3487_v3  ;;  %v643_v15 = vld [vmem:[%s4122_s29] sm:$0xff] }
  0x9b   : > { %2819 = vmatpush3.bf16.msra.mxu0 %v3075_v4 }
  0x9c   : > { %2820 = vmatprep.subr.bf16.mxu0 %v3487_v3 }
  0x9f   : > { %2821 = vmatpush3.bf16.msra.mxu0 %v3076_v5 }
  0xa0   : > { %2822 = vmatprep.subr.bf16.mxu0 %v3487_v3 }
  0xa3   : > { %2823 = vmatpush3.bf16.msra.mxu0 %v3077_v6 }
  0xa4   : > { %2824 = vmatprep.subr.bf16.mxu0 %v3487_v3 }
  0xa7   : > { %2825 = vmatpush3.bf16.msra.mxu0 %v3078_v7 }
  0xa8   : > { %2826 = vmatprep.subr.bf16.mxu0 %v3487_v3 }
  0xab   : > { %2827 = vmatpush3.bf16.msra.mxu0 %v3079_v8 }
  0xac   : > { %2828 = vmatprep.subr.bf16.mxu0 %v3487_v3 }
  0xaf   : > { %2829 = vmatpush3.bf16.msra.mxu0 %v3080_v9 }
  0xb0   : > { %2830 = vmatprep.subr.bf16.mxu0 %v3487_v3 }
  0xb3   : > { %2831 = vmatpush3.bf16.msra.mxu0 %v3081_v10 }
 0x112   : > { %v622_v13 = vpop.permute.xlu0 %621 }
 0x113   : > { %vm623_vm1 = vcmp.eq.s32.totalorder %v622_v13, %v619_v12 }
 0x114   : > { %vm2599_vm2 = vmpackc.low %vm623_vm1, %vm623_vm1 }
 0x115   : > { %2833 = vmatmul.mubr.msk.bf16.vlgmr.msra.gmra.mxu0 %vm2599_vm2, %v3489_v14 }
 0x1d5   : > { %v726_v16 = vpop.f32.mrf.mxu0 }
 0x1d6   : > { %v727_v17 = vadd.f32 %v726_v16, %v643_v15 }
 0x1d7   : > { %v2834_v18 = vpop.f32.mrf.mxu0 }
 0x1d8   : > { %732 = vst [vmem:[#allocation2] sm:$0xff] %v727_v17 }
 0x1d9   : > { %v729_v19 = vpop.f32.mrf.mxu0 }
 0x1db   : > { %v2835_v20 = vpop.f32.mrf.mxu0 }
 0x1dc PF: > { %v3082_v23 = vld [vmem:[%s3755_s23 + $0xac] ss:$12 sps:$4 sm:$0xff]   ;;  %v3084_v24 = vld [vmem:[%s3755_s23 + $0xa8] ss:$12 sps:$4 sm:$0xff]   ;;  %v3085_v25 = vld [vmem:[%s3755_s23 + $0xb0] ss:$12 sps:$4 sm:$0xff]   ;;  %v749_v56 = vlaneseq }
 0x1dd   : > { %920 = vmatprep.subr.bf16.mxu0 %v3082_v23  ;;  %v3490_v26 = vmov 0.0   ;;  %v3086_v27 = vld [vmem:[%s3755_s23 + $0x94] ss:$12 sps:$4 sm:$0xff]   ;;  %v3088_v28 = vld [vmem:[%s3755_s23 + $0x90] ss:$12 sps:$4 sm:$0xff]   ;;  %v3491_v43 = vmov 0  }
 0x1de   : > { %2836 = vmatprep.subr.bf16.mxu1 %v3490_v26  ;;  %921 = vmatpush1.bf16.msra.mxu0 %v3084_v24  ;;  %v3089_v29 = vld [vmem:[%s3755_s23 + $0x98] ss:$12 sps:$4 sm:$0xff]   ;;  %v3090_v30 = vld [vmem:[%s3755_s23 + $0x7c] ss:$12 sps:$4 sm:$0xff]   ;;  %v3093_v32 = vld [vmem:[%s3755_s23 + $0x80] ss:$12 sps:$4 sm:$0xff]  }
 0x1df   : > { %v3801_v21 = vld [vmem:[#allocation2] sm:$0xff]  ;;  %2837 = vmatpush3.bf16.msra.mxu1 %v3085_v25  ;;  %922 = vmatprep.subr.bf16.mxu0 %v3086_v27  ;;  %v3094_v33 = vld [vmem:[%s3755_s23 + $0x64] ss:$12 sps:$4 sm:$0xff]   ;;  %v3096_v34 = vld [vmem:[%s3755_s23 + $0x60] ss:$12 sps:$4 sm:$0xff]   ;;  %vm3492_vm3 = vmmov 0  }
 0x1e0   : > { %735 = vadd.xlane.f32.xlu0 %v3801_v21  ;;  %v739_v22 = vmul.f32 %v3801_v21, %v3801_v21  ;;  %2838 = vmatprep.subr.bf16.mxu1 %v3490_v26  ;;  %v3092_v31 = vld [vmem:[%s3755_s23 + $0x78] ss:$12 sps:$4 sm:$0xff]   ;;  %v3097_v35 = vld [vmem:[%s3755_s23 + $0x68] ss:$12 sps:$4 sm:$0xff]   ;;  %v3101_v38 = vld [vmem:[%s3755_s23 + $0x50] ss:$12 sps:$4 sm:$0xff]  }
 0x1e1   : > { %v3098_v36 = vld [vmem:[%s3755_s23 + $0x4c] ss:$12 sps:$4 sm:$0xff]   ;;  %v3100_v37 = vld [vmem:[%s3755_s23 + $0x48] ss:$12 sps:$4 sm:$0xff]   ;;  %v3104_v40 = vld [vmem:[%s3755_s23 + $0x30] ss:$12 sps:$4 sm:$0xff]   ;;  %952 = vmatprep.mubr.bf16.mxu0 %v3491_v43  ;;  %2852 = vmatprep.mubr.msk.bf16.mxu1 %vm3492_vm3, %v3490_v26 }
 0x1e2   : > { %923 = vmatpush1.bf16.msra.mxu0 %v3088_v28  ;;  %v3102_v39 = vld [vmem:[%s3755_s23 + $0x34] ss:$12 sps:$4 sm:$0xff]   ;;  %v3105_v41 = vld [vmem:[%s3755_s23 + $0x38] ss:$12 sps:$4 sm:$0xff]   ;;  %v3106_v42 = vld [vmem:[%s3755_s23 + $0x1c] ss:$12 sps:$4 sm:$0xff]  }
 0x1e3   : > { %2839 = vmatpush3.bf16.msra.mxu1 %v3089_v29  ;;  %924 = vmatprep.subr.bf16.mxu0 %v3090_v30  ;;  %v3108_v44 = vld [vmem:[%s3755_s23 + $0x18] ss:$12 sps:$4 sm:$0xff]   ;;  %v3109_v45 = vld [vmem:[%s3755_s23 + $0x20] ss:$12 sps:$4 sm:$0xff]   ;;  %v3113_v48 = vld [vmem:[%s3755_s23 + $0x8] ss:$12 sps:$4 sm:$0xff]  }
 0x1e4   : > { %740 = vadd.xlane.f32.xlu0 %v739_v22  ;;  %2840 = vmatprep.subr.bf16.mxu1 %v3490_v26  ;;  %v3110_v46 = vld [vmem:[%s3755_s23 + $0x4] ss:$12 sps:$4 sm:$0xff]   ;;  %v3112_v47 = vld [vmem:[%s3755_s23] ss:$12 sps:$4 sm:$0xff]   ;;  %v3843_v57 = vshrl.u32 %v749_v56, 7  ;;  %v3847_v59 = vld [vmem:[%s3785_s22] sm:$0xff] }
 0x1e5   : > { %vm1010_vm4 = vcmask 261120   ;;  %s3493_s23 = smov 96   ;;  %s3494_s10 = smov 32   ;;  %vm1073_vm5 = vcmask 1043456   ;;  %v1007_v18 = vand.u32 127, %v749_v56  ;;  %vm1057_vm7 = vcmask 64512  }
 0x1e6   : > { %925 = vmatpush1.bf16.msra.mxu0 %v3092_v31  ;;  %v751_v58 = vsub.s32 0, %v3843_v57  ;;  %v756_v60 = vsub.s32 1, %v3843_v57  ;;  %v3495_v19 = vmov -1e+30   ;;  %s3496_s30 = smov 64   ;;  %vm1463_vm8 = vcmask 523264  }
 0x1e7   : > { %2841 = vmatpush3.bf16.msra.mxu1 %v3093_v32  ;;  %926 = vmatprep.subr.bf16.mxu0 %v3094_v33  ;;  %vm1008_vm6 = vcmp.le.s32.totalorder %v1007_v18, %v3843_v57  ;;  %vm1465_vm9 = vcmask 785408   ;;  %p2705_p1 = scmp.ne.s32.totalorder %s3456_s20, 1 }
 0x1e8   : > { %2842 = vmatprep.subr.bf16.mxu1 %v3490_v26  ;;  %v752_v62 = vrot.slane %v3847_v59, %v751_v58  ;;  %v757_v1 = vrot.slane %v3847_v59, %v756_v60  ;;  %v3874_v20 = vsel %vm1008_vm6, 0.0, %v3495_v19 }
 0x1ea   : > { %927 = vmatpush1.bf16.msra.mxu0 %v3096_v34 }
 0x1eb   : > { %2843 = vmatpush3.bf16.msra.mxu1 %v3097_v35  ;;  %928 = vmatprep.subr.bf16.mxu0 %v3098_v36 }
 0x1ec   : > { %2844 = vmatprep.subr.bf16.mxu1 %v3490_v26 }
 0x1ee   : > { %929 = vmatpush1.bf16.msra.mxu0 %v3100_v37 }
 0x1ef   : > { %2845 = vmatpush3.bf16.msra.mxu1 %v3101_v38  ;;  %930 = vmatprep.subr.bf16.mxu0 %v3102_v39 }
 0x1f0   : > { %2846 = vmatprep.subr.bf16.mxu1 %v3490_v26 }
 0x1f2   : > { %931 = vmatpush1.bf16.msra.mxu0 %v3104_v40 }
 0x1f3   : > { %2847 = vmatpush3.bf16.msra.mxu1 %v3105_v41  ;;  %932 = vmatprep.subr.bf16.mxu0 %v3106_v42 }
 0x1f4   : > { %2848 = vmatprep.subr.bf16.mxu1 %v3490_v26 }
 0x1f6   : > { %933 = vmatpush1.bf16.msra.mxu0 %v3108_v44 }
 0x1f7   : > { %2849 = vmatpush3.bf16.msra.mxu1 %v3109_v45  ;;  %934 = vmatprep.subr.bf16.mxu0 %v3110_v46 }
 0x1f8   : > { %2850 = vmatprep.subr.bf16.mxu1 %v3490_v26 }
 0x1fa   : > { %935 = vmatpush1.bf16.msra.mxu0 %v3112_v47 }
 0x1fb   : > { %2851 = vmatpush3.bf16.msra.mxu1 %v3113_v48  ;;  %2880 = vmatprep.subr.bf16.mxu0 %v3490_v26 }
 0x1fc   : > { %2856 = vmatprep.subr.bf16.mxu1 %v3490_v26 }
 0x269   : > { %v736_v49 = vpop.xlane.xlu0 %735 }
 0x26a   : > { %v738_v50 = vmul.f32 0.0078125, %v736_v49 }
 0x26c   : > { %v743_v52 = vmul.f32 %v738_v50, %v738_v50  ;;  %v745_v61 = vsub.f32 %v3801_v21, %v738_v50 }
 0x26d   : > { %v741_v51 = vpop.xlane.xlu0 %740 }
 0x26e   : > { %v742_v53 = vmul.f32 0.0078125, %v741_v51 }
 0x270   : > { %v744_v54 = vsub.f32 %v742_v53, %v743_v52 }
 0x272   : > { %v746_v55 = vadd.f32 1e-05, %v744_v54 }
 0x274   : > { %3202 = vrsqrt.f32 %v746_v55 }
 0x281   : > { %v3203_v63 = vpop.eup %3202 }
 0x282   : > { %v748_v0 = vmul.f32 %v3203_v63, %v745_v61 }
 0x284   : > { %v753_v2 = vmul.f32 %v752_v62, %v748_v0 }
 0x286   : > { %v758_v3 = vadd.f32 %v757_v1, %v753_v2 }
 0x288   : > { %v759_v4 = vpack.c.bf16 %v758_v3, %v758_v3 }
 0x28a   : > { %953 = vmatmul.mubr.bf16.vlgmr.msra.gmra.mxu0 %v759_v4  ;;  %2853 = vmatmul.mubr.bf16.vlgmr.msra.gmra.mxu1 %v759_v4 }
 0x28b   : > { %2858 = vmatprep.mubr.msk.bf16.mxu1 %vm3492_vm3, %v3490_v26  ;;  %2882 = vmatprep.mubr.msk.bf16.mxu0 %vm3492_vm3, %v3490_v26 }
 0x34a   : > { %v954_v5 = vpop.f32.mrf.mxu0  ;;  %v995_v6 = vpop.f32.mrf.mxu1 }
 0x34b   : > { %v3864_v15 = vpack.c.bf16 %v995_v6, %v995_v6  ;;  %v1001_v16 = vpack.c.bf16 %v954_v5, %v954_v5 }
 0x34c   : > { %v956_v7 = vpop.f32.mrf.mxu0  ;;  %v2854_v8 = vpop.f32.mrf.mxu1 }
 0x34d   : > { %v1002_v9 = vpack.c.bf16 %v956_v7, %v956_v7  ;;  %v1075_v17 = vsel %vm1073_vm5, %v3864_v15, 0 }
 0x34e   : > { %v958_v10 = vpop.f32.mrf.mxu0  ;;  %v998_v11 = vpop.f32.mrf.mxu1 }
 0x34f   : > { %1121 = vrot.lane.b32.xlu0 %v1002_v9, %s3493_s23  ;;  %v1015_v12 = vsel %vm1010_vm4, %v1002_v9, 0 }
 0x350   : > { %v959_v13 = vpop.f32.mrf.mxu0  ;;  %v2855_v14 = vpop.f32.mrf.mxu1  ;;  %2857 = vmatpush3.bf16.xpose.msra.mxu1 %v1015_v12 }
 0x351   : > { %2862 = vmatprep.subr.bf16.mxu1 %v3490_v26 }
 0x353   : > { %1342 = vrot.lane.b32.xlu0 %v1002_v9, %s3494_s10 }
 0x357   : > { %2859 = vmatmul.mubr.msk.bf16.vlgmr.msra.gmra.mxu1 %vm1010_vm4, %v1001_v16 }
 0x358   : > { %2863 = vmatpush3.bf16.msra.mxu1 %v1075_v17  ;;  %2864 = vmatprep.mubr.msk.bf16.mxu1 %vm3492_vm3, %v3490_v26 }
 0x359   : > { %2868 = vmatprep.subr.bf16.mxu1 %v3490_v26 }
 0x3c1   : > { %v1122_v36 = vpop.permute.xlu0 %1121 }
 0x3c2   : > { %v1127_v46 = vsel %vm1010_vm4, %v1122_v36, 0 }
 0x3c5   : > { %v1343_v40 = vpop.permute.xlu0 %1342 }
 0x3c6   : > { %v1348_v44 = vsel %vm1010_vm4, %v1343_v40, 0 }
 0x417   : > { %v1051_v22 = vpop.f32.mrf.mxu1 }
 0x418   : > { %v1052_v23 = vadd.f32 %v1051_v22, %v3874_v20 }
 0x419   : > { %v2860_v24 = vpop.f32.mrf.mxu1 }
 0x41a   : > { %v1058_v25 = vsel %vm1057_vm7, %v1052_v23, -inf }
 0x41b   : > { %1059 = vmax.xlane.f32.xlu1 %v1058_v25  ;;  %v1054_v27 = vpop.f32.mrf.mxu1 }
 0x41d   : > { %v2861_v28 = vpop.f32.mrf.mxu1 }
 0x4a4   : > { %v1060_v29 = vpop.xlane.xlu1 %1059 }
 0x4a5   : > { %v1061_v30 = vsub.f32 %v1052_v23, %v1060_v29 }
 0x4a7   : > { %v1062_v31 = vmul.f32 1.442695, %v1061_v30 }
 0x4a9   : > { %3204 = vpow2.f32 %v1062_v31 }
 0x4b6   : > { %v3205_v32 = vpop.eup %3204 }
 0x4b7   : > { %v1064_v33 = vsel %vm1057_vm7, %v3205_v32, 0.0 }
 0x4b8   : > { %1065 = vadd.xlane.f32.xlu1 %v1064_v33 }
 0x4c9   : > { %1118 = vrot.lane.b32.xlu1 %v1001_v16, %s3493_s23 }
 0x4cd   : > { %1232 = vrot.lane.b32.xlu1 %v1002_v9, %s3496_s30 }
 0x4d1   : > { %1230 = vrot.lane.b32.xlu1 %v1001_v16, %s3496_s30 }
 0x4d5   : > { %1340 = vrot.lane.b32.xlu1 %v1001_v16, %s3494_s10 }
 0x541   : > { %v1066_v34 = vpop.xlane.xlu1 %1065 }
 0x542   : > { %3206 = vrcp.f32 %v1066_v34 }
 0x545   : > { %v1119_v35 = vpop.permute.xlu1 %1118 }
 0x549   : > { %v1233_v37 = vpop.permute.xlu1 %1232 }
 0x54a   : > { %v1238_v38 = vsel %vm1010_vm4, %v1233_v37, 0 }
 0x54b   : > { %2881 = vmatpush3.bf16.xpose.msra.mxu0 %v1238_v38 }
 0x54c   : > { %2892 = vmatprep.subr.bf16.mxu0 %v3490_v26 }
 0x54d   : > { %v1231_v42 = vpop.permute.xlu1 %1230 }
 0x54f   : > { %v3207_v39 = vpop.eup %3206 }
 0x550   : > { %v1068_v41 = vmul.f32 %v3207_v39, %v3205_v32 }
 0x551   : > { %v1341_v47 = vpop.permute.xlu1 %1340 }
 0x552   : > { %2883 = vmatmul.mubr.msk.bf16.vlgmr.msra.gmra.mxu0 %vm1010_vm4, %v1231_v42  ;;  %v1069_v45 = vpack.c.bf16 %v1068_v41, %v1068_v41 }
 0x553   : > { %2893 = vmatpush3.bf16.xpose.msra.mxu0 %v1348_v44  ;;  %2894 = vmatprep.mubr.msk.bf16.mxu0 %vm3492_vm3, %v3490_v26 }
 0x554   : > { %2865 = vmatmul.mubr.msk.bf16.vlgmr.msra.gmra.mxu1 %vm1057_vm7, %v1069_v45  ;;  %2904 = vmatprep.subr.bf16.mxu0 %v3490_v26 }
 0x555   : > { %2869 = vmatpush3.bf16.xpose.msra.mxu1 %v1127_v46  ;;  %2870 = vmatprep.mubr.msk.bf16.mxu1 %vm3492_vm3, %v3490_v26  ;;  %v3114_v46 = vld [vmem:[%s3761_s19 + $0x38] sm:$0xff]  }
 0x556   : > { %2874 = vmatprep.subr.bf16.mxu1 %v3490_v26 }
 0x55a   : > { %2895 = vmatmul.mubr.msk.bf16.vlgmr.msra.gmra.mxu0 %vm1010_vm4, %v1341_v47  ;;  %v3115_v47 = vld [vmem:[%s3761_s19 + $0x30] sm:$0xff]  }
 0x55b   : > { %2920 = vmatprep.mubr.msk.bf16.mxu0 %vm3492_vm3, %v3490_v26  ;;  %2905 = vmatpush3.bf16.msra.mxu0 %v3114_v46  ;;  %v3160_v46 = vld [vmem:[%s3763_s13 + $0x24] ss:$16 sps:$4 sm:$0xff]  }
 0x55c   : > { %2871 = vmatmul.mubr.msk.bf16.vlgmr.msra.gmra.mxu1 %vm1010_vm4, %v1119_v35  ;;  %2906 = vmatprep.subr.bf16.mxu0 %v3490_v26 }
 0x55d   : > { %2876 = vmatprep.mubr.msk.bf16.mxu1 %vm3492_vm3, %v3490_v26 }
 0x55f   : > { %2907 = vmatpush3.bf16.msra.mxu0 %v3115_v47  ;;  %v3163_v47 = vld [vmem:[%s3763_s13 + $0x2c] ss:$16 sps:$4 sm:$0xff]  }
 0x560   : > { %2908 = vmatprep.subr.bf16.mxu0 %v3490_v26 }
 0x612   : > { %v1274_v48 = vpop.f32.mrf.mxu0 }
 0x613   : > { %v1275_v49 = vadd.f32 %v1274_v48, %v3874_v20  ;;  %v3116_v48 = vld [vmem:[%s3761_s19 + $0x28] sm:$0xff]  }
 0x614   : > { %v3902_v50 = vpop.f32.mrf.mxu1  ;;  %v2884_v51 = vpop.f32.mrf.mxu0  ;;  %2909 = vmatpush3.bf16.msra.mxu0 %v3116_v48  ;;  %v3158_v48 = vld [vmem:[%s3763_s13 + $0x20] ss:$16 sps:$4 sm:$0xff]  }
 0x615   : > { %v1280_v52 = vsel %vm1057_vm7, %v1275_v49, -inf  ;;  %2910 = vmatprep.subr.bf16.mxu0 %v3490_v26  ;;  %v3118_v51 = vld [vmem:[%s3761_s19 + $0x18] sm:$0xff]  }
 0x616   : > { %v2866_v53 = vpop.f32.mrf.mxu1  ;;  %1281 = vmax.xlane.f32.xlu1 %v1280_v52  ;;  %v1277_v54 = vpop.f32.mrf.mxu0  ;;  %v3119_v52 = vld [vmem:[%s3761_s19 + $0x10] sm:$0xff]  }
 0x617   : > { %v3120_v53 = vld [vmem:[%s3761_s19 + $0x8] sm:$0xff]  }
 0x618   : > { %v1114_v55 = vpop.f32.mrf.mxu1  ;;  %v2885_v56 = vpop.f32.mrf.mxu0 }
 0x619   : > { %v3121_v56 = vld [vmem:[%s3761_s19] sm:$0xff]  }
 0x61a   : > { %v2867_v61 = vpop.f32.mrf.mxu1  ;;  %v1384_v62 = vpop.f32.mrf.mxu0 }
 0x61b   : > { %v1385_v4 = vadd.f32 %v1384_v62, %v3874_v20 }
 0x61c   : > { %v1163_v63 = vpop.f32.mrf.mxu1  ;;  %v2896_v0 = vpop.f32.mrf.mxu0 }
 0x61d   : > { %v1164_v1 = vadd.f32 %v1163_v63, %v3874_v20  ;;  %v1390_v9 = vsel %vm1057_vm7, %v1385_v4, -inf }
 0x61e   : > { %v2872_v2 = vpop.f32.mrf.mxu1  ;;  %v1387_v3 = vpop.f32.mrf.mxu0 }
 0x61f   : > { %v1169_v5 = vsel %vm1057_vm7, %v1164_v1, -inf }
 0x620   : > { %1170 = vmax.xlane.f32.xlu0 %v1169_v5  ;;  %v1166_v6 = vpop.f32.mrf.mxu1  ;;  %v2897_v7 = vpop.f32.mrf.mxu0 }
 0x622   : > { %v2873_v8 = vpop.f32.mrf.mxu1 }
 0x624   : > { %1391 = vmax.xlane.f32.xlu0 %v1390_v9 }
 0x69f   : > { %v1282_v10 = vpop.xlane.xlu1 %1281 }
 0x6a0   : > { %v1283_v11 = vsub.f32 %v1275_v49, %v1282_v10  ;;  %v3117_v49 = vld [vmem:[%s3761_s19 + $0x20] sm:$0xff]  }
 0x6a1   : > { %2911 = vmatpush3.bf16.msra.mxu0 %v3117_v49  ;;  %v3161_v49 = vld [vmem:[%s3763_s13 + $0x28] ss:$16 sps:$4 sm:$0xff]  }
 0x6a2   : > { %v1284_v12 = vmul.f32 1.442695, %v1283_v11  ;;  %2912 = vmatprep.subr.bf16.mxu0 %v3490_v26 }
 0x6a4   : > { %3208 = vpow2.f32 %v1284_v12 }
 0x6a5   : > { %2913 = vmatpush3.bf16.msra.mxu0 %v3118_v51  ;;  %v3166_v51 = vld [vmem:[%s3763_s13 + $0x4] ss:$16 sps:$4 sm:$0xff]  }
 0x6a6   : > { %2914 = vmatprep.subr.bf16.mxu0 %v3490_v26 }
 0x6a9   : > { %v1171_v13 = vpop.xlane.xlu0 %1170  ;;  %2915 = vmatpush3.bf16.msra.mxu0 %v3119_v52  ;;  %v3169_v52 = vld [vmem:[%s3763_s13 + $0xc] ss:$16 sps:$4 sm:$0xff]  }
 0x6aa   : > { %v1172_v14 = vsub.f32 %v1164_v1, %v1171_v13  ;;  %2916 = vmatprep.subr.bf16.mxu0 %v3490_v26  ;;  %v3122_v13 = vld [vmem:[%s3763_s13 + $0xe0] ss:$16 sps:$4 sm:$0xff]  }
 0x6ac   : > { %v1173_v16 = vmul.f32 1.442695, %v1172_v14  ;;  %v3124_v14 = vld [vmem:[%s3763_s13 + $0xe4] ss:$16 sps:$4 sm:$0xff]  }
 0x6ad   : > { %v1392_v17 = vpop.xlane.xlu0 %1391  ;;  %2917 = vmatpush3.bf16.msra.mxu0 %v3120_v53  ;;  %v3164_v53 = vld [vmem:[%s3763_s13] ss:$16 sps:$4 sm:$0xff]  }
 0x6ae   : > { %3210 = vpow2.f32 %v1173_v16  ;;  %v1393_v18 = vsub.f32 %v1385_v4, %v1392_v17  ;;  %2918 = vmatprep.subr.bf16.mxu0 %v3490_v26  ;;  %v3125_v16 = vld [vmem:[%s3763_s13 + $0xe8] ss:$16 sps:$4 sm:$0xff]   ;;  %v3127_v17 = vld [vmem:[%s3763_s13 + $0xec] ss:$16 sps:$4 sm:$0xff]  }
 0x6b0   : > { %v1394_v19 = vmul.f32 1.442695, %v1393_v18 }
 0x6b1   : > { %v3209_v20 = vpop.eup %3208  ;;  %2919 = vmatpush3.bf16.msra.mxu0 %v3121_v56  ;;  %v3171_v56 = vld [vmem:[%s3769_s17 + $0xf8] sm:$0xff]  }
 0x6b2   : > { %3212 = vpow2.f32 %v1394_v19  ;;  %v1286_v22 = vsel %vm1057_vm7, %v3209_v20, 0.0  ;;  %1857 = vmatprep.subr.bf16.mxu0 %v3127_v17  ;;  %v3175_v17 = vld [vmem:[%s3769_s17 + $0xf0] sm:$0xff]  }
 0x6b3   : > { %1287 = vadd.xlane.f32.xlu0 %v1286_v22 }
 0x6bb   : > { %v3211_v23 = vpop.eup %3210 }
 0x6bc   : > { %v1175_v24 = vsel %vm1057_vm7, %v3211_v23, 0.0 }
 0x6bd   : > { %1176 = vadd.xlane.f32.xlu0 %v1175_v24 }
 0x6bf   : > { %v3213_v25 = vpop.eup %3212 }
 0x6c0   : > { %v1396_v27 = vsel %vm1057_vm7, %v3213_v25, 0.0 }
 0x6c1   : > { %1397 = vadd.xlane.f32.xlu1 %v1396_v27  ;;  %v3130_v27 = vld [vmem:[%s3763_s13 + $0xc4] ss:$16 sps:$4 sm:$0xff]  }
 0x6d2   : > { %1292 = vrot.lane.b32.xlu1 %v3864_v15, %s3496_s30 }
 0x6d3   : > { %1182 = vrot.lane.b32.xlu0 %v3864_v15, %s3493_s23 }
 0x6d6   : > { %1402 = vrot.lane.b32.xlu1 %v3864_v15, %s3494_s10 }
 0x73c   : > { %v1288_v28 = vpop.xlane.xlu0 %1287 }
 0x746   : > { %v1177_v29 = vpop.xlane.xlu0 %1176 }
 0x747   : > { %3214 = vrcp.f32 %v1177_v29  ;;  %v3131_v29 = vld [vmem:[%s3763_s13 + $0xc8] ss:$16 sps:$4 sm:$0xff]  }
 0x748   : > { %3216 = vrcp.f32 %v1288_v28  ;;  %v3133_v28 = vld [vmem:[%s3763_s13 + $0xcc] ss:$16 sps:$4 sm:$0xff]  }
 0x74a   : > { %v1183_v30 = vpop.permute.xlu0 %1182  ;;  %v1398_v32 = vpop.xlane.xlu1 %1397 }
 0x74b   : > { %v1188_v31 = vsel %vm1073_vm5, %v1183_v30, 0  ;;  %3218 = vrcp.f32 %v1398_v32  ;;  %v3136_v30 = vld [vmem:[%s3763_s13 + $0xa4] ss:$16 sps:$4 sm:$0xff]   ;;  %v3134_v32 = vld [vmem:[%s3763_s13 + $0xa0] ss:$16 sps:$4 sm:$0xff]  }
 0x74c   : > { %2875 = vmatpush3.bf16.msra.mxu1 %v1188_v31  ;;  %v3139_v31 = vld [vmem:[%s3763_s13 + $0xac] ss:$16 sps:$4 sm:$0xff]  }
 0x74d   : > { %2886 = vmatprep.subr.bf16.mxu1 %v3490_v26 }
 0x74e   : > { %v1293_v35 = vpop.permute.xlu1 %1292 }
 0x74f   : > { %v1298_v38 = vsel %vm1073_vm5, %v1293_v35, 0  ;;  %v3142_v35 = vld [vmem:[%s3763_s13 + $0x84] ss:$16 sps:$4 sm:$0xff]  }
 0x752   : > { %v1403_v39 = vpop.permute.xlu1 %1402 }
 0x753   : > { %v1408_v42 = vsel %vm1073_vm5, %v1403_v39, 0  ;;  %v3146_v39 = vld [vmem:[%s3763_s13 + $0x60] ss:$16 sps:$4 sm:$0xff]  }
 0x754   : > { %v3215_v33 = vpop.eup %3214 }
 0x755   : > { %v1179_v34 = vmul.f32 %v3215_v33, %v3211_v23  ;;  %v3217_v37 = vpop.eup %3216  ;;  %v3137_v33 = vld [vmem:[%s3763_s13 + $0xa8] ss:$16 sps:$4 sm:$0xff]  }
 0x756   : > { %v1290_v15 = vmul.f32 %v3217_v37, %v3209_v20  ;;  %v3145_v37 = vld [vmem:[%s3763_s13 + $0x8c] ss:$16 sps:$4 sm:$0xff]  }
 0x757   : > { %v1180_v36 = vpack.c.bf16 %v1179_v34, %v1179_v34  ;;  %v3140_v34 = vld [vmem:[%s3763_s13 + $0x80] ss:$16 sps:$4 sm:$0xff]  }
 0x758   : > { %v1291_v40 = vpack.c.bf16 %v1290_v15, %v1290_v15  ;;  %v3219_v41 = vpop.eup %3218  ;;  %v3151_v15 = vld [vmem:[%s3763_s13 + $0x6c] ss:$16 sps:$4 sm:$0xff]  }
 0x759   : > { %2877 = vmatmul.mubr.msk.bf16.vlgmr.msra.gmra.mxu1 %vm1057_vm7, %v1180_v36  ;;  %v1400_v44 = vmul.f32 %v3219_v41, %v3213_v25  ;;  %v3143_v36 = vld [vmem:[%s3763_s13 + $0x88] ss:$16 sps:$4 sm:$0xff]   ;;  %v3154_v41 = vld [vmem:[%s3763_s13 + $0x44] ss:$16 sps:$4 sm:$0xff]  }
 0x75a   : > { %2887 = vmatpush3.bf16.msra.mxu1 %v1298_v38  ;;  %2888 = vmatprep.mubr.msk.bf16.mxu1 %vm3492_vm3, %v3490_v26  ;;  %v3148_v38 = vld [vmem:[%s3763_s13 + $0x64] ss:$16 sps:$4 sm:$0xff]  }
 0x75b   : > { %2898 = vmatprep.subr.bf16.mxu1 %v3490_v26  ;;  %v1401_v45 = vpack.c.bf16 %v1400_v44, %v1400_v44  ;;  %v3152_v44 = vld [vmem:[%s3763_s13 + $0x40] ss:$16 sps:$4 sm:$0xff]  }
 0x761   : > { %2889 = vmatmul.mubr.msk.bf16.vlgmr.msra.gmra.mxu1 %vm1057_vm7, %v1291_v40  ;;  %v3149_v40 = vld [vmem:[%s3763_s13 + $0x68] ss:$16 sps:$4 sm:$0xff]  }
 0x762   : > { %2899 = vmatpush3.bf16.msra.mxu1 %v1408_v42  ;;  %2900 = vmatprep.mubr.msk.bf16.mxu1 %vm3492_vm3, %v3490_v26  ;;  %v3157_v42 = vld [vmem:[%s3763_s13 + $0x4c] ss:$16 sps:$4 sm:$0xff]  }
 0x763   : > { %1816 = vmatprep.subr.bf16.mxu1 %v3124_v14 }
 0x769   : > { %2901 = vmatmul.mubr.msk.bf16.vlgmr.msra.gmra.mxu1 %vm1057_vm7, %v1401_v45  ;;  %v3155_v45 = vld [vmem:[%s3763_s13 + $0x48] ss:$16 sps:$4 sm:$0xff]  }
 0x76a   : > { %1848 = vmatprep.mubr.bf16.mxu1 %v3491_v43  ;;  %1817 = vmatpush1.bf16.msra.mxu1 %v3122_v13  ;;  %v3173_v13 = vld [vmem:[%s3769_s17 + $0xb8] sm:$0xff]  }
 0x76b   : > { %1818 = vmatprep.subr.bf16.mxu1 %v3130_v27  ;;  %v3183_v27 = vld [vmem:[%s3769_s17 + $0xe0] sm:$0xff]  }
 0x819   : > { %v1224_v54 = vpop.f32.mrf.mxu1 }
 0x81a   : > { %1451 = vrot.lane.b32.xlu1 %v1224_v54, %s3494_s10  ;;  %v3167_v54 = vld [vmem:[%s3763_s13 + $0x8] ss:$16 sps:$4 sm:$0xff]  }
 0x81b   : > { %v2878_v55 = vpop.f32.mrf.mxu1 }
 0x81c   : > { %v3170_v55 = vld [vmem:[%s3769_s17 + $0x78] sm:$0xff]  }
 0x81d   : > { %v1227_v61 = vpop.f32.mrf.mxu1 }
 0x81f   : > { %v2879_v62 = vpop.f32.mrf.mxu1 }
 0x821   : > { %v1334_v63 = vpop.f32.mrf.mxu1 }
 0x822   : > { %1455 = vrot.lane.b32.xlu0 %v1334_v63, %s3496_s30 }
 0x823   : > { %v2890_v0 = vpop.f32.mrf.mxu1 }
 0x825   : > { %v1337_v1 = vpop.f32.mrf.mxu1 }
 0x827   : > { %v2891_v2 = vpop.f32.mrf.mxu1 }
 0x829   : > { %v1444_v3 = vpop.f32.mrf.mxu1 }
 0x82a   : > { %1459 = vrot.lane.b32.xlu1 %v1444_v3, %s3493_s23 }
 0x82b   : > { %v2902_v4 = vpop.f32.mrf.mxu1 }
 0x82c   : > { %v1593_v4 = vsub.s32 3, %v3843_v57 }
 0x82d   : > { %v1447_v5 = vpop.f32.mrf.mxu1 }
 0x82e   : > { %v1598_v5 = vsub.s32 4, %v3843_v57 }
 0x82f   : > { %v2903_v26 = vpop.f32.mrf.mxu1 }
 0x88c   : > { %v1452_v6 = vpop.permute.xlu1 %1451 }
 0x88d   : > { %v1462_v8 = vsel %vm1010_vm4, %v3902_v50, %v1452_v6  ;;  %v1575_v50 = vsub.s32 2, %v3843_v57  ;;  %v1594_v6 = vrot.slane %v3847_v59, %v1593_v4 }
 0x88f   : > { %v1576_v18 = vrot.slane %v3847_v59, %v1575_v50 }
 0x894   : > { %v1456_v7 = vpop.permute.xlu0 %1455 }
 0x895   : > { %v1464_v9 = vsel %vm1463_vm8, %v1462_v8, %v1456_v7 }
 0x89c   : > { %v1460_v10 = vpop.permute.xlu1 %1459 }
 0x89d   : > { %v1466_v11 = vsel %vm1465_vm9, %v1464_v9, %v1460_v10  ;;  %v1599_v9 = vrot.slane %v3847_v59, %v1598_v5 }
 0x89e   : > { %v1467_v12 = vpack.c.bf16 %v1466_v11, %v1466_v11 }
 0x8a0   : > { %2921 = vmatmul.mubr.bf16.vlgmr.msra.gmra.mxu0 %v1467_v12  ;;  %v3172_v12 = vld [vmem:[%s3769_s17 + $0x38] sm:$0xff]  }
 0x8a1   : > { %1889 = vmatprep.mubr.bf16.mxu0 %v3491_v43  ;;  %1858 = vmatpush1.bf16.msra.mxu0 %v3125_v16  ;;  %v3174_v16 = vld [vmem:[%s3769_s17 + $0x70] sm:$0xff]  }
 0x8a2   : > { %1859 = vmatprep.subr.bf16.mxu0 %v3133_v28  ;;  %v3184_v28 = vld [vmem:[%s3769_s17 + $0x20] sm:$0xff]  }
 0x8a5   : > { %1860 = vmatpush1.bf16.msra.mxu0 %v3131_v29  ;;  %v3186_v29 = vld [vmem:[%s3769_s17 + $0x58] sm:$0xff]  }
 0x8a6   : > { %1861 = vmatprep.subr.bf16.mxu0 %v3139_v31  ;;  %v3188_v31 = vld [vmem:[%s3769_s17 + $0x18] sm:$0xff]  }
 0x8a9   : > { %1862 = vmatpush1.bf16.msra.mxu0 %v3137_v33  ;;  %v3190_v33 = vld [vmem:[%s3769_s17 + $0x50] sm:$0xff]  }
 0x8aa   : > { %1863 = vmatprep.subr.bf16.mxu0 %v3145_v37  ;;  %v3194_v37 = vld [vmem:[%s3769_s17 + $0x48] sm:$0xff]  }
 0x8ad   : > { %1864 = vmatpush1.bf16.msra.mxu0 %v3143_v36  ;;  %v3193_v36 = vld [vmem:[%s3769_s17 + $0x90] sm:$0xff]  }
 0x8ae   : > { %1865 = vmatprep.subr.bf16.mxu0 %v3151_v15  ;;  %v3196_v15 = vld [vmem:[%s3769_s17 + $0x8] sm:$0xff]  }
 0x8b1   : > { %1866 = vmatpush1.bf16.msra.mxu0 %v3149_v40  ;;  %v3198_v40 = vld [vmem:[%s3769_s17 + $0x40] sm:$0xff]  }
 0x8b2   : > { %1867 = vmatprep.subr.bf16.mxu0 %v3157_v42  ;;  %v3200_v42 = vld [vmem:[%s3769_s17] sm:$0xff]  }
 0x8b5   : > { %1868 = vmatpush1.bf16.msra.mxu0 %v3155_v45  ;;  %v1634_v45 = vld [vmem:[%s3790_s27] sm:$0xf] }
 0x8b6   : > { %1869 = vmatprep.subr.bf16.mxu0 %v3163_v47  ;;  %v1647_v47 = vrot.slane %v1634_v45, %v1575_v50 }
 0x8b9   : > { %1870 = vmatpush1.bf16.msra.mxu0 %v3161_v49  ;;  %v1651_v49 = vrot.slane %v1634_v45, %v1593_v4 }
 0x8ba   : > { %1871 = vmatprep.subr.bf16.mxu0 %v3169_v52 }
 0x8bd   : > { %1872 = vmatpush1.bf16.msra.mxu0 %v3167_v54 }
 0x8be   : > { %2785 = vmatprep.subr.bf16.mxu0 %v3171_v56 }
 0x960   : > { %v1566_v19 = vpop.f32.mrf.mxu0 }
 0x961   : > { %v1572_v43 = vadd.f32 %v1566_v19, %v3801_v21  ;;  %v3128_v21 = vld [vmem:[%s3763_s13 + $0xc0] ss:$16 sps:$4 sm:$0xff]   ;;  %s4123_s13 = sld [smem:[#allocation30_spill]] (!%p2705_p1) }
 0x962   : > { %v2922_v20 = vpop.f32.mrf.mxu0  ;;  %1819 = vmatpush1.bf16.msra.mxu1 %v3128_v21  ;;  %v3177_v19 = vld [vmem:[%s3769_s17 + $0xb0] sm:$0xff]   ;;  %v3185_v21 = vld [vmem:[%s3769_s17 + $0xa0] sm:$0xff]  }
 0x963   : > { %v3961_v22 = vadd.f32 %v1576_v18, %v1572_v43  ;;  %1820 = vmatprep.subr.bf16.mxu1 %v3136_v30  ;;  %v3176_v18 = vld [vmem:[%s3769_s17 + $0x30] sm:$0xff]   ;;  %v3178_v43 = vld [vmem:[%s3769_s17 + $0x68] sm:$0xff]   ;;  %v3187_v30 = vld [vmem:[%s3769_s17 + $0xd8] sm:$0xff]  }
 0x964   : > { %v1569_v23 = vpop.f32.mrf.mxu0  ;;  %v3179_v20 = vld [vmem:[%s3769_s17 + $0xe8] sm:$0xff]  }
 0x965   : > { %1578 = vadd.xlane.f32.xlu0 %v3961_v22  ;;  %v1581_v24 = vmul.f32 %v3961_v22, %v3961_v22  ;;  %v3180_v23 = vld [vmem:[%s3769_s17 + $0x28] sm:$0xff]  }
 0x966   : > { %v2923_v25 = vpop.f32.mrf.mxu0  ;;  %1821 = vmatpush1.bf16.msra.mxu1 %v3134_v32  ;;  %v3189_v32 = vld [vmem:[%s3769_s17 + $0x98] sm:$0xff]  }
 0x967   : > { %1582 = vadd.xlane.f32.xlu1 %v1581_v24  ;;  %1822 = vmatprep.subr.bf16.mxu1 %v3142_v35  ;;  %v3181_v24 = vld [vmem:[%s3769_s17 + $0xa8] sm:$0xff]   ;;  %v3182_v25 = vld [vmem:[%s3769_s17 + $0x60] sm:$0xff]   ;;  %v3192_v35 = vld [vmem:[%s3769_s17 + $0x10] sm:$0xff]  }
 0x96a   : > { %1823 = vmatpush1.bf16.msra.mxu1 %v3140_v34  ;;  %v3191_v34 = vld [vmem:[%s3769_s17 + $0xd0] sm:$0xff]  }
 0x96b   : > { %1824 = vmatprep.subr.bf16.mxu1 %v3148_v38  ;;  %v3195_v38 = vld [vmem:[%s3769_s17 + $0xc8] sm:$0xff]  }
 0x96e   : > { %1825 = vmatpush1.bf16.msra.mxu1 %v3146_v39  ;;  %v3197_v39 = vld [vmem:[%s3769_s17 + $0x88] sm:$0xff]  }
 0x96f   : > { %1826 = vmatprep.subr.bf16.mxu1 %v3154_v41  ;;  %v3199_v41 = vld [vmem:[%s3769_s17 + $0xc0] sm:$0xff]  }
 0x972   : > { %1827 = vmatpush1.bf16.msra.mxu1 %v3152_v44  ;;  %v3201_v44 = vld [vmem:[%s3769_s17 + $0x80] sm:$0xff]  }
 0x973   : > { %1828 = vmatprep.subr.bf16.mxu1 %v3160_v46  ;;  %v1639_v46 = vrot.slane %v1634_v45, %v751_v58 }
 0x976   : > { %1829 = vmatpush1.bf16.msra.mxu1 %v3158_v48  ;;  %v1643_v48 = vrot.slane %v1634_v45, %v756_v60 }
 0x977   : > { %1830 = vmatprep.subr.bf16.mxu1 %v3166_v51 }
 0x97a   : > { %1831 = vmatpush1.bf16.msra.mxu1 %v3164_v53 }
 0x97b   : > { %2763 = vmatprep.subr.bf16.mxu1 %v3170_v55 }
 0x9ee   : > { %v1579_v61 = vpop.xlane.xlu0 %1578 }
 0x9ef   : > { %v1580_v62 = vmul.f32 0.0078125, %v1579_v61 }
 0x9f0   : > { %v1583_v63 = vpop.xlane.xlu1 %1582 }
 0x9f1   : > { %v1585_v0 = vmul.f32 %v1580_v62, %v1580_v62  ;;  %v1584_v1 = vmul.f32 0.0078125, %v1583_v63  ;;  %v1587_v26 = vsub.f32 %v3961_v22, %v1580_v62 }
 0x9f3   : > { %v1586_v2 = vsub.f32 %v1584_v1, %v1585_v0 }
 0x9f5   : > { %v1588_v3 = vadd.f32 1e-05, %v1586_v2 }
 0x9f7   : > { %3220 = vrsqrt.f32 %v1588_v3 }
 0xa04   : > { %v3221_v7 = vpop.eup %3220 }
 0xa05   : > { %v1590_v8 = vmul.f32 %v3221_v7, %v1587_v26 }
 0xa07   : > { %v1595_v10 = vmul.f32 %v1594_v6, %v1590_v8 }
 0xa09   : > { %v1600_v11 = vadd.f32 %v1599_v9, %v1595_v10  ;;  %v2245_v9 = vsub.s32 5, %v3843_v57 }
 0xa0b   : > { %v1601_v14 = vpack.c.bf16 %v1600_v11, %v1600_v11 }
 0xa0d   : > { %1849 = vmatmul.mubr.bf16.vlgmr.msra.gmra.mxu1 %v1601_v14  ;;  %1890 = vmatmul.mubr.bf16.vlgmr.msra.gmra.mxu0 %v1601_v14 }
 0xa0e   : > { %2764 = vmatpush3.bf16.msra.mxu1 %v3172_v12  ;;  %2786 = vmatpush3.bf16.msra.mxu0 %v3173_v13 }
 0xa0f   : > { %2765 = vmatprep.subr.bf16.mxu1 %v3174_v16  ;;  %2787 = vmatprep.subr.bf16.mxu0 %v3175_v17 }
 0xa12   : > { %2766 = vmatpush3.bf16.msra.mxu1 %v3176_v18  ;;  %2788 = vmatpush3.bf16.msra.mxu0 %v3177_v19  ;;  %v2246_v18 = vrot.slane %v3847_v59, %v2245_v9 }
 0xa13   : > { %2767 = vmatprep.subr.bf16.mxu1 %v3178_v43  ;;  %2789 = vmatprep.subr.bf16.mxu0 %v3179_v20 }
 0xa16   : > { %2768 = vmatpush3.bf16.msra.mxu1 %v3180_v23  ;;  %2790 = vmatpush3.bf16.msra.mxu0 %v3181_v24 }
 0xa17   : > { %2769 = vmatprep.subr.bf16.mxu1 %v3182_v25  ;;  %2791 = vmatprep.subr.bf16.mxu0 %v3183_v27 }
 0xa1a   : > { %2770 = vmatpush3.bf16.msra.mxu1 %v3184_v28  ;;  %2792 = vmatpush3.bf16.msra.mxu0 %v3185_v21 }
 0xa1b   : > { %2771 = vmatprep.subr.bf16.mxu1 %v3186_v29  ;;  %2793 = vmatprep.subr.bf16.mxu0 %v3187_v30 }
 0xa1e   : > { %2772 = vmatpush3.bf16.msra.mxu1 %v3188_v31  ;;  %2794 = vmatpush3.bf16.msra.mxu0 %v3189_v32 }
 0xa1f   : > { %2773 = vmatprep.subr.bf16.mxu1 %v3190_v33  ;;  %2795 = vmatprep.subr.bf16.mxu0 %v3191_v34 }
 0xa22   : > { %2774 = vmatpush3.bf16.msra.mxu1 %v3192_v35  ;;  %2796 = vmatpush3.bf16.msra.mxu0 %v3193_v36 }
 0xa23   : > { %2775 = vmatprep.subr.bf16.mxu1 %v3194_v37  ;;  %2797 = vmatprep.subr.bf16.mxu0 %v3195_v38 }
 0xa26   : > { %2776 = vmatpush3.bf16.msra.mxu1 %v3196_v15  ;;  %2798 = vmatpush3.bf16.msra.mxu0 %v3197_v39 }
 0xa27   : > { %2777 = vmatprep.subr.bf16.mxu1 %v3198_v40  ;;  %2799 = vmatprep.subr.bf16.mxu0 %v3199_v41 }
 0xa2a   : > { %2778 = vmatpush3.bf16.msra.mxu1 %v3200_v42  ;;  %2800 = vmatpush3.bf16.msra.mxu0 %v3201_v44 }
 0xacd   : > { %v1850_v51 = vpop.f32.mrf.mxu1  ;;  %v1891_v52 = vpop.f32.mrf.mxu0 }
 0xace   : > { %v1851_v53 = vadd.f32 %v1850_v51, %v1639_v46  ;;  %v1892_v54 = vadd.f32 %v1891_v52, %v1647_v47 }
 0xacf   : > { %v1852_v55 = vpop.f32.mrf.mxu1  ;;  %v1893_v56 = vpop.f32.mrf.mxu0 }
 0xad0   : > { %v1853_v61 = vadd.f32 %v1852_v55, %v1643_v48  ;;  %v1894_v62 = vadd.f32 %v1893_v56, %v1651_v49  ;;  %v1898_v63 = vmax.f32 %v1851_v53, 0.0  ;;  %v1900_v0 = vmax.f32 %v1892_v54, 0.0 }
 0xad1   : > { %v1854_v58 = vpop.f32.mrf.mxu1  ;;  %v1895_v1 = vpop.f32.mrf.mxu0 }
 0xad2   : > { %v1899_v2 = vmax.f32 %v1853_v61, 0.0  ;;  %v1901_v50 = vmax.f32 %v1894_v62, 0.0  ;;  %v1902_v6 = vpack.c.bf16 %v1898_v63, %v1898_v63  ;;  %v1904_v4 = vpack.c.bf16 %v1900_v0, %v1900_v0 }
 0xad3   : > { %v1855_v3 = vpop.f32.mrf.mxu1  ;;  %v1896_v5 = vpop.f32.mrf.mxu0 }
 0xad4   : > { %v1903_v60 = vpack.c.bf16 %v1899_v2, %v1899_v2  ;;  %v1905_v26 = vpack.c.bf16 %v1901_v50, %v1901_v50 }
 0xad6   : > { %2194 = vmatprep.mubr.bf16.mxu1 %v1903_v60  ;;  %2234 = vmatprep.mubr.bf16.mxu0 %v1905_v26 }
 0xad7   : > { %2195 = vmatmul.mubr.bf16.vlgmr.msra.gmra.mxu1 %v1902_v6  ;;  %2235 = vmatmul.mubr.bf16.vlgmr.msra.gmra.mxu0 %v1904_v4 }
 0xb97   : > { %v2779_v7 = vpop.f32.mrf.mxu1  ;;  %v2801_v8 = vpop.f32.mrf.mxu0 }
 0xb99   : > { %v2780_v10 = vpop.f32.mrf.mxu1  ;;  %v2802_v11 = vpop.f32.mrf.mxu0 }
 0xb9a   : > { %v2781_v12 = vadd.f32 %v2780_v10, %v2779_v7  ;;  %v2803_v13 = vadd.f32 %v2802_v11, %v2801_v8 }
 0xb9b   : > { %v2782_v14 = vpop.f32.mrf.mxu1  ;;  %v2804_v16 = vpop.f32.mrf.mxu0 }
 0xb9c   : > { %v2237_v17 = vadd.f32 %v2803_v13, %v2781_v12 }
 0xb9d   : > { %v2783_v19 = vpop.f32.mrf.mxu1  ;;  %v2805_v43 = vpop.f32.mrf.mxu0 }
 0xb9e   : > { %v2242_v20 = vadd.f32 %v2237_v17, %v3961_v22  ;;  %2252 = sbr.rel (%p2705_p1) target bundleno = 3211 (0xc8b), region = 96 }
 0xba0   : > { %v2247_v23 = vadd.f32 %v2246_v18, %v2242_v20 }
 0xba2   : > { %2248 = vst [vmem:[#allocation2] sm:$0xff] %v2247_v23 }
 0xba3   : > { %v3222_v24 = vld [vmem:[#allocation11 + $0x38] sm:$0xff]   ;;  %v3497_v57 = vmov 0.0   ;;  %v3223_v25 = vld [vmem:[#allocation11 + $0x30] sm:$0xff]   ;;  %vm3498_vm10 = vmmov 0   ;;  %v3224_v27 = vld [vmem:[#allocation11 + $0x28] sm:$0xff]   ;;  %v2253_v30 = vpack.c.bf16 %v2247_v23, %v2247_v23 }
 0xba4   : > { %2924 = vmatprep.subr.bf16.mxu0 %v3497_v57  ;;  %2940 = vmatprep.mubr.msk.bf16.mxu0 %vm3498_vm10, %v3497_v57  ;;  %v3225_v59 = vld [vmem:[#allocation11 + $0x20] sm:$0xff]   ;;  %v3226_v22 = vld [vmem:[#allocation11 + $0x18] sm:$0xff]   ;;  %v3227_v28 = vld [vmem:[#allocation11 + $0x10] sm:$0xff]  }
 0xba5   : > { %2925 = vmatpush3.bf16.msra.mxu0 %v3222_v24  ;;  %v3228_v21 = vld [vmem:[#allocation11 + $0x8] sm:$0xff]   ;;  %v3229_v29 = vld [vmem:[#allocation11] sm:$0xff]   ;;  %v2706_v31 = vld [vmem:[%s4123_s13] ss:$0 sm:$0xff] }
 0xba6   : > { %2926 = vmatprep.subr.bf16.mxu0 %v3497_v57 }
 0xba9   : > { %2927 = vmatpush3.bf16.msra.mxu0 %v3223_v25 }
 0xbaa   : > { %2928 = vmatprep.subr.bf16.mxu0 %v3497_v57 }
 0xbad   : > { %2929 = vmatpush3.bf16.msra.mxu0 %v3224_v27 }
 0xbae   : > { %2930 = vmatprep.subr.bf16.mxu0 %v3497_v57 }
 0xbb1   : > { %2931 = vmatpush3.bf16.msra.mxu0 %v3225_v59 }
 0xbb2   : > { %2932 = vmatprep.subr.bf16.mxu0 %v3497_v57 }
 0xbb5   : > { %2933 = vmatpush3.bf16.msra.mxu0 %v3226_v22 }
 0xbb6   : > { %2934 = vmatprep.subr.bf16.mxu0 %v3497_v57 }
 0xbb9   : > { %2935 = vmatpush3.bf16.msra.mxu0 %v3227_v28 }
 0xbba   : > { %2936 = vmatprep.subr.bf16.mxu0 %v3497_v57 }
 0xbbd   : > { %2937 = vmatpush3.bf16.msra.mxu0 %v3228_v21 }
 0xbbe   : > { %2938 = vmatprep.subr.bf16.mxu0 %v3497_v57 }
 0xbc1   : > { %2939 = vmatpush3.bf16.msra.mxu0 %v3229_v29 }
 0xbc4   : > { %2941 = vmatmul.mubr.bf16.vlgmr.msra.gmra.mxu0 %v2253_v30 }
 0xc84   : > { %v2359_v32 = vpop.f32.mrf.mxu0 }
 0xc85   : > { %v2360_v33 = vadd.f32 %v2706_v31, %v2359_v32 }
 0xc86   : > { %v2942_v34 = vpop.f32.mrf.mxu0 }
 0xc87   : > { %2365 = vst [vmem:[%s3795_s21] sm:$0xff] %v2360_v33 }
 0xc88   : > { %v2362_v35 = vpop.f32.mrf.mxu0 }
 0xc8a   : > { %v2943_v36 = vpop.f32.mrf.mxu0 }
 0xc8b PF: > { %s29_s24 = sadd.s32 1, %s3472_s24   ;;  %s4124_s16 = sld [smem:[#allocation17_spill]] }
 0xc8c   : > { %p26_p2 = scmp.ge.s32.totalorder %s29_s24, 6   ;;  %s4125_s19 = sld [smem:[#allocation22_spill]] }
 0xc8d   : > { %s4126_s20 = sld [smem:[#allocation18_spill]]  ;;  %s4130_s17 = smov %s3448_s18 }
 0xc8e   : > { %s4127_s21 = sld [smem:[#allocation19_spill]]  ;;  %28 = sbr.rel (!%p26_p2) target bundleno = 19 (0x13), region = 165 }
 0xc8f   : > { %s4128_s22 = sld [smem:[#allocation20_spill]] }
 0xc90   : > { %s4129_s23 = sld [smem:[#allocation21_spill]] }
 0xc91   : > { %s4131_s18 = smov %s4124_s16 }
 0xc93   :  { %2385 = vsyncpa [#allocation4], 1 }
 0xc94   :  { %2387 = vsyncpa [#allocation4 + $0x1], 1 }
 0xc95   :  { %2388 = vsyncpa [#allocation6], 1 }
 0xc96   :  { %2390 = vsyncpa [#allocation6 + $0x1], 1 }
 0xc97   :  { %2391 = vsyncpa [#allocation9], 1 }
 0xc98   :  { %2393 = vsyncpa [#allocation9 + $0x1], 1 }
 0xc99   :  { %2394 = vsyncpa [#allocation12], 1 }

</bundles_post_ra>
